<compile_context>
chip_gen: v7x
topology: tpu7x:2x2x1
jax: 0.10.0
libtpu: 0.0.40
codegen_flags: <defaults>
</compile_context>

<pallas_src>
import functools
import math

import jax
import jax.numpy as jnp
from jax.experimental import pallas as pl
from jax.experimental.pallas import tpu as pltpu

# ----------------------------- model config ---------------------------------
BATCH = 2
SEQ = 8
HIDDEN = 32          # n_embd
N_HEADS = 4          # num_heads
N_LAYERS = 2         # num_layers
N_INNER = HIDDEN     # GPT2Config(n_inner=hidden_size)
VOCAB = 16           # vocab_size
LN_EPS = 1e-5


# ------------------------------ shared math ----------------------------------
def _layernorm(x, g, b, eps=LN_EPS):
    mu = jnp.mean(x, axis=-1, keepdims=True)
    var = jnp.mean(jnp.square(x - mu), axis=-1, keepdims=True)
    return (x - mu) * jax.lax.rsqrt(var + eps) * g + b


def _gelu_new(x):
    # GPT-2 "gelu_new" (tanh approximation)
    return 0.5 * x * (1.0 + jnp.tanh(
        jnp.sqrt(2.0 / jnp.pi) * (x + 0.044715 * x * x * x)))


# ------------------------------ Pallas kernel --------------------------------
def gpt2_stack_kernel(n_heads, num_layers, B, S,
                      tok_ref, wte_ref, pe_ref,
                      ln1g_ref, ln1b_ref, wqkv_ref, bqkv_ref,
                      wo_ref, bo_ref, ln2g_ref, ln2b_ref,
                      wfc_ref, bfc_ref, wproj_ref, bproj_ref,
                      lnfg_ref, lnfb_ref, out_ref):
    BS, H = out_ref.shape
    V = wte_ref.shape[0]
    hd = H // n_heads
    scale = 1.0 / math.sqrt(hd)

    # -------- fused embedding: one-hot(tokens) @ wte + positional table ------
    tok = tok_ref[...]                                          # (BS, 1) int32
    onehot = (tok == jax.lax.broadcasted_iota(jnp.int32, (BS, V), 1)
              ).astype(jnp.float32)                             # (BS, V)
    emb = jnp.dot(onehot, wte_ref[...], preferred_element_type=jnp.float32)
    h = (emb.reshape(B, S, H) + pe_ref[...][None, :, :]).reshape(BS, H)

    # -------- causal additive mask, built once (hoisted out of layer loop) ---
    row = jax.lax.broadcasted_iota(jnp.int32, (S, S), 0)
    col = jax.lax.broadcasted_iota(jnp.int32, (S, S), 1)
    mask = jnp.broadcast_to(
        jnp.where(row >= col, 0.0, -1e30).astype(jnp.float32)[None, :, :],
        (n_heads * B, S, S))

    def split_heads(m2d):                        # (BS, H) -> (n_heads*B, S, hd)
        m3 = m2d.reshape(B, S, H)
        return jnp.concatenate(
            [m3[:, :, hh * hd:(hh + 1) * hd] for hh in range(n_heads)], axis=0)

    for l in range(num_layers):                  # static unroll: h stays in vregs
        # ---------------- attention block ----------------
        x1 = _layernorm(h, ln1g_ref[l], ln1b_ref[l])
        qkv = jnp.dot(x1, wqkv_ref[l],
                      preferred_element_type=jnp.float32) + bqkv_ref[l]
        q = split_heads(qkv[:, 0:H])
        k = split_heads(qkv[:, H:2 * H])
        v = split_heads(qkv[:, 2 * H:3 * H])

        # single batched-head score / softmax / PV (batch dim = n_heads*B)
        s = jnp.einsum('bqd,bkd->bqk', q, k,
                       preferred_element_type=jnp.float32) * scale + mask
        s = s - jnp.max(s, axis=-1, keepdims=True)
        p = jnp.exp(s)
        p = p * pl.reciprocal(jnp.sum(p, axis=-1, keepdims=True), approx=True)
        o = jnp.einsum('bqk,bkd->bqd', p, v,
                       preferred_element_type=jnp.float32)      # (nh*B, S, hd)

        # merge heads and do ONE full-width output projection
        o = jnp.concatenate(
            [o[hh * B:(hh + 1) * B] for hh in range(n_heads)], axis=-1)  # (B,S,H)
        attn = jnp.dot(o.reshape(BS, H), wo_ref[l],
                       preferred_element_type=jnp.float32) + bo_ref[l]
        h = h + attn

        # ---------------- MLP block ----------------
        x2 = _layernorm(h, ln2g_ref[l], ln2b_ref[l])
        a = _gelu_new(jnp.dot(x2, wfc_ref[l],
                              preferred_element_type=jnp.float32) + bfc_ref[l])
        m = jnp.dot(a, wproj_ref[l],
                    preferred_element_type=jnp.float32) + bproj_ref[l]
        h = h + m

    out_ref[...] = _layernorm(h, lnfg_ref[...], lnfb_ref[...])


# ------------------------------ wrapper ---------------------------------------
def gpt2_forward_pallas(tokens, params):
    """tokens: (B, S) int32 -> hiddens: (B, S, H) float32."""
    B, S = tokens.shape
    H = HIDDEN
    BS = B * S

    tok = tokens.reshape(BS, 1).astype(jnp.int32)
    pe = params['wpe'][:S]                                      # (S, H)

    operands = (
        tok, params['wte'], pe,
        params['ln1g'], params['ln1b'],
        params['wqkv'], params['bqkv'],
        params['wo'], params['bo'],
        params['ln2g'], params['ln2b'],
        params['wfc'], params['bfc'],
        params['wproj'], params['bproj'],
        params['lnfg'], params['lnfb'],
    )

    hd = H // N_HEADS
    flops_layer = (2 * BS * H * 3 * H                 # qkv matmul
                   + 4 * N_HEADS * B * S * S * hd     # scores + pv
                   + 2 * BS * H * H                   # attn out proj
                   + 4 * BS * H * N_INNER)            # mlp fc + proj
    cost = pl.CostEstimate(
        flops=2 * BS * VOCAB * H + N_LAYERS * flops_layer,
        transcendentals=N_LAYERS * (N_HEADS * B * S * S   # exp
                                    + BS * N_INNER        # tanh
                                    + N_HEADS * B * S),   # reciprocal
        bytes_accessed=int(sum(int(x.size) * x.dtype.itemsize for x in operands)
                           + BS * H * 4),
    )

    kernel = functools.partial(gpt2_stack_kernel, N_HEADS, N_LAYERS, B, S)

    out2d = pl.pallas_call(
        kernel,
        out_shape=jax.ShapeDtypeStruct((BS, H), jnp.float32),
        in_specs=[pl.BlockSpec(memory_space=pltpu.MemorySpace.VMEM)
                  for _ in operands],
        out_specs=pl.BlockSpec(memory_space=pltpu.MemorySpace.VMEM),
        cost_estimate=cost,
    )(*operands)
    return out2d.reshape(B, S, H)


# --------------------------- pure-JAX reference -------------------------------
def gpt2_forward_ref(tokens, params):
    B, S = tokens.shape
    H = HIDDEN
    hd = H // N_HEADS
    h = (params['wte'][tokens] + params['wpe'][:S][None, :, :]).astype(jnp.float32)
    row = jnp.arange(S)[:, None]
    col = jnp.arange(S)[None, :]
    causal = row >= col
    for l in range(N_LAYERS):
        x1 = _layernorm(h, params['ln1g'][l, 0], params['ln1b'][l, 0])
        qkv = x1 @ params['wqkv'][l] + params['bqkv'][l, 0]
        q, k, v = jnp.split(qkv, 3, axis=-1)
        q = q.reshape(B, S, N_HEADS, hd)
        k = k.reshape(B, S, N_HEADS, hd)
        v = v.reshape(B, S, N_HEADS, hd)
        s = jnp.einsum('bqhd,bkhd->bhqk', q, k) / math.sqrt(hd)
        s = jnp.where(causal[None, None], s, -1e30)
        p = jax.nn.softmax(s, axis=-1)
        o = jnp.einsum('bhqk,bkhd->bqhd', p, v).reshape(B, S, H)
        h = h + o @ params['wo'][l] + params['bo'][l, 0]
        x2 = _layernorm(h, params['ln2g'][l, 0], params['ln2b'][l, 0])
        a = _gelu_new(x2 @ params['wfc'][l] + params['bfc'][l, 0])
        h = h + a @ params['wproj'][l] + params['bproj'][l, 0]
    return _layernorm(h, params['lnfg'][0], params['lnfb'][0])


# ------------------------------ parameter init --------------------------------
def init_params(key):
    H, L, V, NI = HIDDEN, N_LAYERS, VOCAB, N_INNER
    ks = jax.random.split(key, 8)
    std = 0.02

    # Sinusoidal position table ('cos' embedding type):
    #   wpe[pos, i] = sin(pos / 10000**(2i/H)) if i even else cos(...)
    pos = jnp.arange(SEQ, dtype=jnp.float32)[:, None]
    i = jnp.arange(H, dtype=jnp.float32)[None, :]
    angle = pos / jnp.power(10000.0, 2.0 * i / H)
    wpe = jnp.where((jnp.arange(H) % 2 == 0)[None, :],
                    jnp.sin(angle), jnp.cos(angle)).astype(jnp.float32)

    params = {
        'wte': std * jax.random.normal(ks[0], (V, H), jnp.float32),
        'wpe': wpe,
        'ln1g': jnp.ones((L, 1, H), jnp.float32),
        'ln1b': jnp.zeros((L, 1, H), jnp.float32),
        'wqkv': std * jax.random.normal(ks[1], (L, H, 3 * H), jnp.float32),
        'bqkv': jnp.zeros((L, 1, 3 * H), jnp.float32),
        'wo': std * jax.random.normal(ks[2], (L, H, H), jnp.float32),
        'bo': jnp.zeros((L, 1, H), jnp.float32),
        'ln2g': jnp.ones((L, 1, H), jnp.float32),
        'ln2b': jnp.zeros((L, 1, H), jnp.float32),
        'wfc': std * jax.random.normal(ks[3], (L, H, NI), jnp.float32),
        'bfc': jnp.zeros((L, 1, NI), jnp.float32),
        'wproj': std * jax.random.normal(ks[4], (L, NI, H), jnp.float32),
        'bproj': jnp.zeros((L, 1, H), jnp.float32),
        'lnfg': jnp.ones((1, H), jnp.float32),
        'lnfb': jnp.zeros((1, H), jnp.float32),
    }
    return params


# ---------------------------------- main ---------------------------------------
if __name__ == "__main__":
    key = jax.random.PRNGKey(0)
    pkey, tkey = jax.random.split(key)
    params = init_params(pkey)
    tokens = jax.random.randint(tkey, (BATCH, SEQ), 0, VOCAB, dtype=jnp.int32)

    out = gpt2_forward_pallas(tokens, params)
    out = jax.block_until_ready(out)

    ref = gpt2_forward_ref(tokens, params)
    assert out.shape == (BATCH, SEQ, HIDDEN), out.shape
    assert jnp.allclose(out, ref, atol=2e-3, rtol=2e-3), \
        float(jnp.max(jnp.abs(out - ref)))

    print("KERNEL_OK")
</pallas_src>

<mosaic_0001>
module attributes {stable_mosaic.version = 11 : i64} {
  func.func @gpt2_stack_kernel(%arg0: memref<16x1xi32, #tpu.memory_space<vmem>>, %arg1: memref<16x32xf32, #tpu.memory_space<vmem>>, %arg2: memref<8x32xf32, #tpu.memory_space<vmem>>, %arg3: memref<2x1x32xf32, #tpu.memory_space<vmem>>, %arg4: memref<2x1x32xf32, #tpu.memory_space<vmem>>, %arg5: memref<2x32x96xf32, #tpu.memory_space<vmem>>, %arg6: memref<2x1x96xf32, #tpu.memory_space<vmem>>, %arg7: memref<2x32x32xf32, #tpu.memory_space<vmem>>, %arg8: memref<2x1x32xf32, #tpu.memory_space<vmem>>, %arg9: memref<2x1x32xf32, #tpu.memory_space<vmem>>, %arg10: memref<2x1x32xf32, #tpu.memory_space<vmem>>, %arg11: memref<2x32x32xf32, #tpu.memory_space<vmem>>, %arg12: memref<2x1x32xf32, #tpu.memory_space<vmem>>, %arg13: memref<2x32x32xf32, #tpu.memory_space<vmem>>, %arg14: memref<2x1x32xf32, #tpu.memory_space<vmem>>, %arg15: memref<1x32xf32, #tpu.memory_space<vmem>>, %arg16: memref<1x32xf32, #tpu.memory_space<vmem>>, %arg17: memref<16x32xf32, #tpu.memory_space<vmem>>) attributes {dimension_semantics = [], scalar_prefetch = 0 : i64, scratch_operands = 0 : i64, tpu.core_type = #tpu.core_type<tc>} {
    %c0 = arith.constant 0 : index
    %c0_0 = arith.constant 0 : index
    %0 = vector.load %arg0[%c0, %c0_0] : memref<16x1xi32, #tpu.memory_space<vmem>>, vector<16x1xi32>
    %1 = tpu.iota {dimensions = array<i32: 1>} : vector<16x16xi32>
    %2 = vector.broadcast %0 : vector<16x1xi32> to vector<16x16xi32>
    %3 = arith.cmpi eq, %2, %1 : vector<16x16xi32>
    %4 = arith.extui %3 : vector<16x16xi1> to vector<16x16xi32>
    %5 = arith.sitofp %4 : vector<16x16xi32> to vector<16x16xf32>
    %c0_1 = arith.constant 0 : index
    %c0_2 = arith.constant 0 : index
    %6 = vector.load %arg1[%c0_1, %c0_2] : memref<16x32xf32, #tpu.memory_space<vmem>>, vector<16x32xf32>
    %cst = arith.constant dense<0.000000e+00> : vector<16x32xf32>
    %7 = tpu.matmul %5, %6, %cst {dimension_numbers = #tpu.dot_dimension_numbers<[1], [0], [0], [1], [0, 0, 1, 1], [], []>} : vector<16x16xf32>, vector<16x32xf32>, vector<16x32xf32> -> vector<16x32xf32>
    %8 = vector.shape_cast %7 : vector<16x32xf32> to vector<2x8x32xf32>
    %c0_3 = arith.constant 0 : index
    %c0_4 = arith.constant 0 : index
    %9 = vector.load %arg2[%c0_3, %c0_4] : memref<8x32xf32, #tpu.memory_space<vmem>>, vector<8x32xf32>
    %10 = vector.shape_cast %9 : vector<8x32xf32> to vector<1x8x32xf32>
    %11 = vector.broadcast %10 : vector<1x8x32xf32> to vector<2x8x32xf32>
    %12 = arith.addf %8, %11 : vector<2x8x32xf32>
    %13 = vector.shape_cast %12 : vector<2x8x32xf32> to vector<16x32xf32>
    %14 = tpu.iota {dimensions = array<i32: 0>} : vector<8x8xi32>
    %15 = tpu.iota {dimensions = array<i32: 1>} : vector<8x8xi32>
    %16 = arith.cmpi sge, %14, %15 : vector<8x8xi32>
    %cst_5 = arith.constant 0.000000e+00 : f32
    %cst_6 = arith.constant -1.000000e+30 : f32
    %17 = vector.broadcast %cst_5 : f32 to vector<8x8xf32>
    %18 = vector.broadcast %cst_6 : f32 to vector<8x8xf32>
    %19 = arith.select %16, %17, %18 : vector<8x8xi1>, vector<8x8xf32>
    %20 = vector.shape_cast %19 : vector<8x8xf32> to vector<1x8x8xf32>
    %21 = vector.shape_cast %20 : vector<1x8x8xf32> to vector<1x8x8xf32>
    %22 = vector.broadcast %21 : vector<1x8x8xf32> to vector<8x8x8xf32>
    %c0_7 = arith.constant 0 : index
    %c0_8 = arith.constant 0 : index
    %c0_9 = arith.constant 0 : index
    %23 = vector.load %arg3[%c0_7, %c0_8, %c0_9] : memref<2x1x32xf32, #tpu.memory_space<vmem>>, vector<1x1x32xf32>
    %24 = vector.shape_cast %23 : vector<1x1x32xf32> to vector<1x32xf32>
    %c0_10 = arith.constant 0 : index
    %c0_11 = arith.constant 0 : index
    %c0_12 = arith.constant 0 : index
    %25 = vector.load %arg4[%c0_10, %c0_11, %c0_12] : memref<2x1x32xf32, #tpu.memory_space<vmem>>, vector<1x1x32xf32>
    %26 = vector.shape_cast %25 : vector<1x1x32xf32> to vector<1x32xf32>
    %cst_13 = arith.constant dense<0.000000e+00> : vector<16xf32>
    %27 = vector.multi_reduction <add>, %13, %cst_13 [1] : vector<16x32xf32> to vector<16xf32>
    %28 = vector.shape_cast %27 : vector<16xf32> to vector<16x1xf32>
    %cst_14 = arith.constant 3.200000e+01 : f32
    %29 = vector.broadcast %cst_14 : f32 to vector<16x1xf32>
    %30 = arith.divf %28, %29 : vector<16x1xf32>
    %31 = vector.broadcast %30 : vector<16x1xf32> to vector<16x32xf32>
    %32 = arith.subf %13, %31 : vector<16x32xf32>
    %33 = arith.mulf %32, %32 : vector<16x32xf32>
    %cst_15 = arith.constant dense<0.000000e+00> : vector<16xf32>
    %34 = vector.multi_reduction <add>, %33, %cst_15 [1] : vector<16x32xf32> to vector<16xf32>
    %35 = vector.shape_cast %34 : vector<16xf32> to vector<16x1xf32>
    %cst_16 = arith.constant 3.200000e+01 : f32
    %36 = vector.broadcast %cst_16 : f32 to vector<16x1xf32>
    %37 = arith.divf %35, %36 : vector<16x1xf32>
    %38 = vector.broadcast %30 : vector<16x1xf32> to vector<16x32xf32>
    %39 = arith.subf %13, %38 : vector<16x32xf32>
    %cst_17 = arith.constant 9.99999974E-6 : f32
    %40 = vector.broadcast %cst_17 : f32 to vector<16x1xf32>
    %41 = arith.addf %37, %40 : vector<16x1xf32>
    %42 = math.rsqrt %41 : vector<16x1xf32>
    %43 = vector.broadcast %42 : vector<16x1xf32> to vector<16x32xf32>
    %44 = arith.mulf %39, %43 : vector<16x32xf32>
    %45 = vector.broadcast %24 : vector<1x32xf32> to vector<16x32xf32>
    %46 = arith.mulf %44, %45 : vector<16x32xf32>
    %47 = vector.broadcast %26 : vector<1x32xf32> to vector<16x32xf32>
    %48 = arith.addf %46, %47 : vector<16x32xf32>
    %c0_18 = arith.constant 0 : index
    %c0_19 = arith.constant 0 : index
    %c0_20 = arith.constant 0 : index
    %49 = vector.load %arg5[%c0_18, %c0_19, %c0_20] : memref<2x32x96xf32, #tpu.memory_space<vmem>>, vector<1x32x96xf32>
    %50 = vector.shape_cast %49 : vector<1x32x96xf32> to vector<32x96xf32>
    %cst_21 = arith.constant dense<0.000000e+00> : vector<16x96xf32>
    %51 = tpu.matmul %48, %50, %cst_21 {dimension_numbers = #tpu.dot_dimension_numbers<[1], [0], [0], [1], [0, 0, 1, 1], [], []>} : vector<16x32xf32>, vector<32x96xf32>, vector<16x96xf32> -> vector<16x96xf32>
    %c0_22 = arith.constant 0 : index
    %c0_23 = arith.constant 0 : index
    %c0_24 = arith.constant 0 : index
    %52 = vector.load %arg6[%c0_22, %c0_23, %c0_24] : memref<2x1x96xf32, #tpu.memory_space<vmem>>, vector<1x1x96xf32>
    %53 = vector.shape_cast %52 : vector<1x1x96xf32> to vector<1x96xf32>
    %54 = vector.broadcast %53 : vector<1x96xf32> to vector<16x96xf32>
    %55 = arith.addf %51, %54 : vector<16x96xf32>
    %56 = vector.extract_strided_slice %55 {offsets = [0, 0], sizes = [16, 32], strides = [1, 1]} : vector<16x96xf32> to vector<16x32xf32>
    %57 = vector.shape_cast %56 : vector<16x32xf32> to vector<2x8x32xf32>
    %58 = vector.extract_strided_slice %57 {offsets = [0, 0, 0], sizes = [2, 8, 8], strides = [1, 1, 1]} : vector<2x8x32xf32> to vector<2x8x8xf32>
    %59 = vector.extract_strided_slice %57 {offsets = [0, 0, 8], sizes = [2, 8, 8], strides = [1, 1, 1]} : vector<2x8x32xf32> to vector<2x8x8xf32>
    %60 = vector.extract_strided_slice %57 {offsets = [0, 0, 16], sizes = [2, 8, 8], strides = [1, 1, 1]} : vector<2x8x32xf32> to vector<2x8x8xf32>
    %61 = vector.extract_strided_slice %57 {offsets = [0, 0, 24], sizes = [2, 8, 8], strides = [1, 1, 1]} : vector<2x8x32xf32> to vector<2x8x8xf32>
    %62 = tpu.concatenate %58, %59, %60, %61 in 0 : vector<2x8x8xf32>, vector<2x8x8xf32>, vector<2x8x8xf32>, vector<2x8x8xf32> -> vector<8x8x8xf32>
    %63 = vector.extract_strided_slice %55 {offsets = [0, 32], sizes = [16, 32], strides = [1, 1]} : vector<16x96xf32> to vector<16x32xf32>
    %64 = vector.shape_cast %63 : vector<16x32xf32> to vector<2x8x32xf32>
    %65 = vector.extract_strided_slice %64 {offsets = [0, 0, 0], sizes = [2, 8, 8], strides = [1, 1, 1]} : vector<2x8x32xf32> to vector<2x8x8xf32>
    %66 = vector.extract_strided_slice %64 {offsets = [0, 0, 8], sizes = [2, 8, 8], strides = [1, 1, 1]} : vector<2x8x32xf32> to vector<2x8x8xf32>
    %67 = vector.extract_strided_slice %64 {offsets = [0, 0, 16], sizes = [2, 8, 8], strides = [1, 1, 1]} : vector<2x8x32xf32> to vector<2x8x8xf32>
    %68 = vector.extract_strided_slice %64 {offsets = [0, 0, 24], sizes = [2, 8, 8], strides = [1, 1, 1]} : vector<2x8x32xf32> to vector<2x8x8xf32>
    %69 = tpu.concatenate %65, %66, %67, %68 in 0 : vector<2x8x8xf32>, vector<2x8x8xf32>, vector<2x8x8xf32>, vector<2x8x8xf32> -> vector<8x8x8xf32>
    %70 = vector.extract_strided_slice %55 {offsets = [0, 64], sizes = [16, 32], strides = [1, 1]} : vector<16x96xf32> to vector<16x32xf32>
    %71 = vector.shape_cast %70 : vector<16x32xf32> to vector<2x8x32xf32>
    %72 = vector.extract_strided_slice %71 {offsets = [0, 0, 0], sizes = [2, 8, 8], strides = [1, 1, 1]} : vector<2x8x32xf32> to vector<2x8x8xf32>
    %73 = vector.extract_strided_slice %71 {offsets = [0, 0, 8], sizes = [2, 8, 8], strides = [1, 1, 1]} : vector<2x8x32xf32> to vector<2x8x8xf32>
    %74 = vector.extract_strided_slice %71 {offsets = [0, 0, 16], sizes = [2, 8, 8], strides = [1, 1, 1]} : vector<2x8x32xf32> to vector<2x8x8xf32>
    %75 = vector.extract_strided_slice %71 {offsets = [0, 0, 24], sizes = [2, 8, 8], strides = [1, 1, 1]} : vector<2x8x32xf32> to vector<2x8x8xf32>
    %76 = tpu.concatenate %72, %73, %74, %75 in 0 : vector<2x8x8xf32>, vector<2x8x8xf32>, vector<2x8x8xf32>, vector<2x8x8xf32> -> vector<8x8x8xf32>
    "tpu.trace_start"() <{level = 10 : i32, message = "bqd,bkd->bqk"}> : () -> ()
    %cst_25 = arith.constant dense<0.000000e+00> : vector<8x8x8xf32>
    %77 = tpu.matmul %62, %69, %cst_25 {dimension_numbers = #tpu.dot_dimension_numbers<[2], [2], [1], [1], [0, 0, 0, 1, 1, 1], [0], [0]>} : vector<8x8x8xf32>, vector<8x8x8xf32>, vector<8x8x8xf32> -> vector<8x8x8xf32>
    "tpu.trace_stop"() : () -> ()
    %cst_26 = arith.constant 0.353553385 : f32
    %78 = vector.broadcast %cst_26 : f32 to vector<8x8x8xf32>
    %79 = arith.mulf %77, %78 : vector<8x8x8xf32>
    %80 = arith.addf %79, %22 : vector<8x8x8xf32>
    %cst_27 = arith.constant dense<0xFF800000> : vector<8x8xf32>
    %81 = vector.multi_reduction <maximumf>, %80, %cst_27 [2] : vector<8x8x8xf32> to vector<8x8xf32>
    %82 = vector.shape_cast %81 : vector<8x8xf32> to vector<8x8x1xf32>
    %83 = vector.broadcast %82 : vector<8x8x1xf32> to vector<8x8x8xf32>
    %84 = arith.subf %80, %83 : vector<8x8x8xf32>
    %85 = math.exp %84 : vector<8x8x8xf32>
    %cst_28 = arith.constant dense<0.000000e+00> : vector<8x8xf32>
    %86 = vector.multi_reduction <add>, %85, %cst_28 [2] : vector<8x8x8xf32> to vector<8x8xf32>
    %87 = vector.shape_cast %86 : vector<8x8xf32> to vector<8x8x1xf32>
    %88 = tpu.reciprocal %87 {approx = true} : vector<8x8x1xf32> -> vector<8x8x1xf32>
    %89 = vector.broadcast %88 : vector<8x8x1xf32> to vector<8x8x8xf32>
    %90 = arith.mulf %85, %89 : vector<8x8x8xf32>
    "tpu.trace_start"() <{level = 10 : i32, message = "bqk,bkd->bqd"}> : () -> ()
    %cst_29 = arith.constant dense<0.000000e+00> : vector<8x8x8xf32>
    %91 = tpu.matmul %90, %76, %cst_29 {dimension_numbers = #tpu.dot_dimension_numbers<[2], [1], [1], [2], [0, 0, 0, 1, 1, 2], [0], [0]>} : vector<8x8x8xf32>, vector<8x8x8xf32>, vector<8x8x8xf32> -> vector<8x8x8xf32>
    "tpu.trace_stop"() : () -> ()
    %92 = vector.extract_strided_slice %91 {offsets = [0, 0, 0], sizes = [2, 8, 8], strides = [1, 1, 1]} : vector<8x8x8xf32> to vector<2x8x8xf32>
    %93 = vector.extract_strided_slice %91 {offsets = [2, 0, 0], sizes = [2, 8, 8], strides = [1, 1, 1]} : vector<8x8x8xf32> to vector<2x8x8xf32>
    %94 = vector.extract_strided_slice %91 {offsets = [4, 0, 0], sizes = [2, 8, 8], strides = [1, 1, 1]} : vector<8x8x8xf32> to vector<2x8x8xf32>
    %95 = vector.extract_strided_slice %91 {offsets = [6, 0, 0], sizes = [2, 8, 8], strides = [1, 1, 1]} : vector<8x8x8xf32> to vector<2x8x8xf32>
    %96 = tpu.concatenate %92, %93, %94, %95 in 2 : vector<2x8x8xf32>, vector<2x8x8xf32>, vector<2x8x8xf32>, vector<2x8x8xf32> -> vector<2x8x32xf32>
    %97 = vector.shape_cast %96 : vector<2x8x32xf32> to vector<16x32xf32>
    %c0_30 = arith.constant 0 : index
    %c0_31 = arith.constant 0 : index
    %c0_32 = arith.constant 0 : index
    %98 = vector.load %arg7[%c0_30, %c0_31, %c0_32] : memref<2x32x32xf32, #tpu.memory_space<vmem>>, vector<1x32x32xf32>
    %99 = vector.shape_cast %98 : vector<1x32x32xf32> to vector<32x32xf32>
    %cst_33 = arith.constant dense<0.000000e+00> : vector<16x32xf32>
    %100 = tpu.matmul %97, %99, %cst_33 {dimension_numbers = #tpu.dot_dimension_numbers<[1], [0], [0], [1], [0, 0, 1, 1], [], []>} : vector<16x32xf32>, vector<32x32xf32>, vector<16x32xf32> -> vector<16x32xf32>
    %c0_34 = arith.constant 0 : index
    %c0_35 = arith.constant 0 : index
    %c0_36 = arith.constant 0 : index
    %101 = vector.load %arg8[%c0_34, %c0_35, %c0_36] : memref<2x1x32xf32, #tpu.memory_space<vmem>>, vector<1x1x32xf32>
    %102 = vector.shape_cast %101 : vector<1x1x32xf32> to vector<1x32xf32>
    %103 = vector.broadcast %102 : vector<1x32xf32> to vector<16x32xf32>
    %104 = arith.addf %100, %103 : vector<16x32xf32>
    %105 = arith.addf %13, %104 : vector<16x32xf32>
    %c0_37 = arith.constant 0 : index
    %c0_38 = arith.constant 0 : index
    %c0_39 = arith.constant 0 : index
    %106 = vector.load %arg9[%c0_37, %c0_38, %c0_39] : memref<2x1x32xf32, #tpu.memory_space<vmem>>, vector<1x1x32xf32>
    %107 = vector.shape_cast %106 : vector<1x1x32xf32> to vector<1x32xf32>
    %c0_40 = arith.constant 0 : index
    %c0_41 = arith.constant 0 : index
    %c0_42 = arith.constant 0 : index
    %108 = vector.load %arg10[%c0_40, %c0_41, %c0_42] : memref<2x1x32xf32, #tpu.memory_space<vmem>>, vector<1x1x32xf32>
    %109 = vector.shape_cast %108 : vector<1x1x32xf32> to vector<1x32xf32>
    %cst_43 = arith.constant dense<0.000000e+00> : vector<16xf32>
    %110 = vector.multi_reduction <add>, %105, %cst_43 [1] : vector<16x32xf32> to vector<16xf32>
    %111 = vector.shape_cast %110 : vector<16xf32> to vector<16x1xf32>
    %cst_44 = arith.constant 3.200000e+01 : f32
    %112 = vector.broadcast %cst_44 : f32 to vector<16x1xf32>
    %113 = arith.divf %111, %112 : vector<16x1xf32>
    %114 = vector.broadcast %113 : vector<16x1xf32> to vector<16x32xf32>
    %115 = arith.subf %105, %114 : vector<16x32xf32>
    %116 = arith.mulf %115, %115 : vector<16x32xf32>
    %cst_45 = arith.constant dense<0.000000e+00> : vector<16xf32>
    %117 = vector.multi_reduction <add>, %116, %cst_45 [1] : vector<16x32xf32> to vector<16xf32>
    %118 = vector.shape_cast %117 : vector<16xf32> to vector<16x1xf32>
    %cst_46 = arith.constant 3.200000e+01 : f32
    %119 = vector.broadcast %cst_46 : f32 to vector<16x1xf32>
    %120 = arith.divf %118, %119 : vector<16x1xf32>
    %121 = vector.broadcast %113 : vector<16x1xf32> to vector<16x32xf32>
    %122 = arith.subf %105, %121 : vector<16x32xf32>
    %cst_47 = arith.constant 9.99999974E-6 : f32
    %123 = vector.broadcast %cst_47 : f32 to vector<16x1xf32>
    %124 = arith.addf %120, %123 : vector<16x1xf32>
    %125 = math.rsqrt %124 : vector<16x1xf32>
    %126 = vector.broadcast %125 : vector<16x1xf32> to vector<16x32xf32>
    %127 = arith.mulf %122, %126 : vector<16x32xf32>
    %128 = vector.broadcast %107 : vector<1x32xf32> to vector<16x32xf32>
    %129 = arith.mulf %127, %128 : vector<16x32xf32>
    %130 = vector.broadcast %109 : vector<1x32xf32> to vector<16x32xf32>
    %131 = arith.addf %129, %130 : vector<16x32xf32>
    %c0_48 = arith.constant 0 : index
    %c0_49 = arith.constant 0 : index
    %c0_50 = arith.constant 0 : index
    %132 = vector.load %arg11[%c0_48, %c0_49, %c0_50] : memref<2x32x32xf32, #tpu.memory_space<vmem>>, vector<1x32x32xf32>
    %133 = vector.shape_cast %132 : vector<1x32x32xf32> to vector<32x32xf32>
    %cst_51 = arith.constant dense<0.000000e+00> : vector<16x32xf32>
    %134 = tpu.matmul %131, %133, %cst_51 {dimension_numbers = #tpu.dot_dimension_numbers<[1], [0], [0], [1], [0, 0, 1, 1], [], []>} : vector<16x32xf32>, vector<32x32xf32>, vector<16x32xf32> -> vector<16x32xf32>
    %c0_52 = arith.constant 0 : index
    %c0_53 = arith.constant 0 : index
    %c0_54 = arith.constant 0 : index
    %135 = vector.load %arg12[%c0_52, %c0_53, %c0_54] : memref<2x1x32xf32, #tpu.memory_space<vmem>>, vector<1x1x32xf32>
    %136 = vector.shape_cast %135 : vector<1x1x32xf32> to vector<1x32xf32>
    %137 = vector.broadcast %136 : vector<1x32xf32> to vector<16x32xf32>
    %138 = arith.addf %134, %137 : vector<16x32xf32>
    %cst_55 = arith.constant 5.000000e-01 : f32
    %139 = vector.broadcast %cst_55 : f32 to vector<16x32xf32>
    %140 = arith.mulf %139, %138 : vector<16x32xf32>
    %cst_56 = arith.constant 0.636619746 : f32
    %141 = math.sqrt %cst_56 : f32
    %cst_57 = arith.constant 4.471500e-02 : f32
    %142 = vector.broadcast %cst_57 : f32 to vector<16x32xf32>
    %143 = arith.mulf %142, %138 : vector<16x32xf32>
    %144 = arith.mulf %143, %138 : vector<16x32xf32>
    %145 = arith.mulf %144, %138 : vector<16x32xf32>
    %146 = arith.addf %138, %145 : vector<16x32xf32>
    %147 = vector.broadcast %141 : f32 to vector<16x32xf32>
    %148 = arith.mulf %147, %146 : vector<16x32xf32>
    %149 = math.tanh %148 : vector<16x32xf32>
    %cst_58 = arith.constant 1.000000e+00 : f32
    %150 = vector.broadcast %cst_58 : f32 to vector<16x32xf32>
    %151 = arith.addf %150, %149 : vector<16x32xf32>
    %152 = arith.mulf %140, %151 : vector<16x32xf32>
    %c0_59 = arith.constant 0 : index
    %c0_60 = arith.constant 0 : index
    %c0_61 = arith.constant 0 : index
    %153 = vector.load %arg13[%c0_59, %c0_60, %c0_61] : memref<2x32x32xf32, #tpu.memory_space<vmem>>, vector<1x32x32xf32>
    %154 = vector.shape_cast %153 : vector<1x32x32xf32> to vector<32x32xf32>
    %cst_62 = arith.constant dense<0.000000e+00> : vector<16x32xf32>
    %155 = tpu.matmul %152, %154, %cst_62 {dimension_numbers = #tpu.dot_dimension_numbers<[1], [0], [0], [1], [0, 0, 1, 1], [], []>} : vector<16x32xf32>, vector<32x32xf32>, vector<16x32xf32> -> vector<16x32xf32>
    %c0_63 = arith.constant 0 : index
    %c0_64 = arith.constant 0 : index
    %c0_65 = arith.constant 0 : index
    %156 = vector.load %arg14[%c0_63, %c0_64, %c0_65] : memref<2x1x32xf32, #tpu.memory_space<vmem>>, vector<1x1x32xf32>
    %157 = vector.shape_cast %156 : vector<1x1x32xf32> to vector<1x32xf32>
    %158 = vector.broadcast %157 : vector<1x32xf32> to vector<16x32xf32>
    %159 = arith.addf %155, %158 : vector<16x32xf32>
    %160 = arith.addf %105, %159 : vector<16x32xf32>
    %c1 = arith.constant 1 : index
    %c0_66 = arith.constant 0 : index
    %c0_67 = arith.constant 0 : index
    %161 = vector.load %arg3[%c1, %c0_66, %c0_67] : memref<2x1x32xf32, #tpu.memory_space<vmem>>, vector<1x1x32xf32>
    %162 = vector.shape_cast %161 : vector<1x1x32xf32> to vector<1x32xf32>
    %c1_68 = arith.constant 1 : index
    %c0_69 = arith.constant 0 : index
    %c0_70 = arith.constant 0 : index
    %163 = vector.load %arg4[%c1_68, %c0_69, %c0_70] : memref<2x1x32xf32, #tpu.memory_space<vmem>>, vector<1x1x32xf32>
    %164 = vector.shape_cast %163 : vector<1x1x32xf32> to vector<1x32xf32>
    %cst_71 = arith.constant dense<0.000000e+00> : vector<16xf32>
    %165 = vector.multi_reduction <add>, %160, %cst_71 [1] : vector<16x32xf32> to vector<16xf32>
    %166 = vector.shape_cast %165 : vector<16xf32> to vector<16x1xf32>
    %cst_72 = arith.constant 3.200000e+01 : f32
    %167 = vector.broadcast %cst_72 : f32 to vector<16x1xf32>
    %168 = arith.divf %166, %167 : vector<16x1xf32>
    %169 = vector.broadcast %168 : vector<16x1xf32> to vector<16x32xf32>
    %170 = arith.subf %160, %169 : vector<16x32xf32>
    %171 = arith.mulf %170, %170 : vector<16x32xf32>
    %cst_73 = arith.constant dense<0.000000e+00> : vector<16xf32>
    %172 = vector.multi_reduction <add>, %171, %cst_73 [1] : vector<16x32xf32> to vector<16xf32>
    %173 = vector.shape_cast %172 : vector<16xf32> to vector<16x1xf32>
    %cst_74 = arith.constant 3.200000e+01 : f32
    %174 = vector.broadcast %cst_74 : f32 to vector<16x1xf32>
    %175 = arith.divf %173, %174 : vector<16x1xf32>
    %176 = vector.broadcast %168 : vector<16x1xf32> to vector<16x32xf32>
    %177 = arith.subf %160, %176 : vector<16x32xf32>
    %cst_75 = arith.constant 9.99999974E-6 : f32
    %178 = vector.broadcast %cst_75 : f32 to vector<16x1xf32>
    %179 = arith.addf %175, %178 : vector<16x1xf32>
    %180 = math.rsqrt %179 : vector<16x1xf32>
    %181 = vector.broadcast %180 : vector<16x1xf32> to vector<16x32xf32>
    %182 = arith.mulf %177, %181 : vector<16x32xf32>
    %183 = vector.broadcast %162 : vector<1x32xf32> to vector<16x32xf32>
    %184 = arith.mulf %182, %183 : vector<16x32xf32>
    %185 = vector.broadcast %164 : vector<1x32xf32> to vector<16x32xf32>
    %186 = arith.addf %184, %185 : vector<16x32xf32>
    %c1_76 = arith.constant 1 : index
    %c0_77 = arith.constant 0 : index
    %c0_78 = arith.constant 0 : index
    %187 = vector.load %arg5[%c1_76, %c0_77, %c0_78] : memref<2x32x96xf32, #tpu.memory_space<vmem>>, vector<1x32x96xf32>
    %188 = vector.shape_cast %187 : vector<1x32x96xf32> to vector<32x96xf32>
    %cst_79 = arith.constant dense<0.000000e+00> : vector<16x96xf32>
    %189 = tpu.matmul %186, %188, %cst_79 {dimension_numbers = #tpu.dot_dimension_numbers<[1], [0], [0], [1], [0, 0, 1, 1], [], []>} : vector<16x32xf32>, vector<32x96xf32>, vector<16x96xf32> -> vector<16x96xf32>
    %c1_80 = arith.constant 1 : index
    %c0_81 = arith.constant 0 : index
    %c0_82 = arith.constant 0 : index
    %190 = vector.load %arg6[%c1_80, %c0_81, %c0_82] : memref<2x1x96xf32, #tpu.memory_space<vmem>>, vector<1x1x96xf32>
    %191 = vector.shape_cast %190 : vector<1x1x96xf32> to vector<1x96xf32>
    %192 = vector.broadcast %191 : vector<1x96xf32> to vector<16x96xf32>
    %193 = arith.addf %189, %192 : vector<16x96xf32>
    %194 = vector.extract_strided_slice %193 {offsets = [0, 0], sizes = [16, 32], strides = [1, 1]} : vector<16x96xf32> to vector<16x32xf32>
    %195 = vector.shape_cast %194 : vector<16x32xf32> to vector<2x8x32xf32>
    %196 = vector.extract_strided_slice %195 {offsets = [0, 0, 0], sizes = [2, 8, 8], strides = [1, 1, 1]} : vector<2x8x32xf32> to vector<2x8x8xf32>
    %197 = vector.extract_strided_slice %195 {offsets = [0, 0, 8], sizes = [2, 8, 8], strides = [1, 1, 1]} : vector<2x8x32xf32> to vector<2x8x8xf32>
    %198 = vector.extract_strided_slice %195 {offsets = [0, 0, 16], sizes = [2, 8, 8], strides = [1, 1, 1]} : vector<2x8x32xf32> to vector<2x8x8xf32>
    %199 = vector.extract_strided_slice %195 {offsets = [0, 0, 24], sizes = [2, 8, 8], strides = [1, 1, 1]} : vector<2x8x32xf32> to vector<2x8x8xf32>
    %200 = tpu.concatenate %196, %197, %198, %199 in 0 : vector<2x8x8xf32>, vector<2x8x8xf32>, vector<2x8x8xf32>, vector<2x8x8xf32> -> vector<8x8x8xf32>
    %201 = vector.extract_strided_slice %193 {offsets = [0, 32], sizes = [16, 32], strides = [1, 1]} : vector<16x96xf32> to vector<16x32xf32>
    %202 = vector.shape_cast %201 : vector<16x32xf32> to vector<2x8x32xf32>
    %203 = vector.extract_strided_slice %202 {offsets = [0, 0, 0], sizes = [2, 8, 8], strides = [1, 1, 1]} : vector<2x8x32xf32> to vector<2x8x8xf32>
    %204 = vector.extract_strided_slice %202 {offsets = [0, 0, 8], sizes = [2, 8, 8], strides = [1, 1, 1]} : vector<2x8x32xf32> to vector<2x8x8xf32>
    %205 = vector.extract_strided_slice %202 {offsets = [0, 0, 16], sizes = [2, 8, 8], strides = [1, 1, 1]} : vector<2x8x32xf32> to vector<2x8x8xf32>
    %206 = vector.extract_strided_slice %202 {offsets = [0, 0, 24], sizes = [2, 8, 8], strides = [1, 1, 1]} : vector<2x8x32xf32> to vector<2x8x8xf32>
    %207 = tpu.concatenate %203, %204, %205, %206 in 0 : vector<2x8x8xf32>, vector<2x8x8xf32>, vector<2x8x8xf32>, vector<2x8x8xf32> -> vector<8x8x8xf32>
    %208 = vector.extract_strided_slice %193 {offsets = [0, 64], sizes = [16, 32], strides = [1, 1]} : vector<16x96xf32> to vector<16x32xf32>
    %209 = vector.shape_cast %208 : vector<16x32xf32> to vector<2x8x32xf32>
    %210 = vector.extract_strided_slice %209 {offsets = [0, 0, 0], sizes = [2, 8, 8], strides = [1, 1, 1]} : vector<2x8x32xf32> to vector<2x8x8xf32>
    %211 = vector.extract_strided_slice %209 {offsets = [0, 0, 8], sizes = [2, 8, 8], strides = [1, 1, 1]} : vector<2x8x32xf32> to vector<2x8x8xf32>
    %212 = vector.extract_strided_slice %209 {offsets = [0, 0, 16], sizes = [2, 8, 8], strides = [1, 1, 1]} : vector<2x8x32xf32> to vector<2x8x8xf32>
    %213 = vector.extract_strided_slice %209 {offsets = [0, 0, 24], sizes = [2, 8, 8], strides = [1, 1, 1]} : vector<2x8x32xf32> to vector<2x8x8xf32>
    %214 = tpu.concatenate %210, %211, %212, %213 in 0 : vector<2x8x8xf32>, vector<2x8x8xf32>, vector<2x8x8xf32>, vector<2x8x8xf32> -> vector<8x8x8xf32>
    "tpu.trace_start"() <{level = 10 : i32, message = "bqd,bkd->bqk"}> : () -> ()
    %cst_83 = arith.constant dense<0.000000e+00> : vector<8x8x8xf32>
    %215 = tpu.matmul %200, %207, %cst_83 {dimension_numbers = #tpu.dot_dimension_numbers<[2], [2], [1], [1], [0, 0, 0, 1, 1, 1], [0], [0]>} : vector<8x8x8xf32>, vector<8x8x8xf32>, vector<8x8x8xf32> -> vector<8x8x8xf32>
    "tpu.trace_stop"() : () -> ()
    %cst_84 = arith.constant 0.353553385 : f32
    %216 = vector.broadcast %cst_84 : f32 to vector<8x8x8xf32>
    %217 = arith.mulf %215, %216 : vector<8x8x8xf32>
    %218 = arith.addf %217, %22 : vector<8x8x8xf32>
    %cst_85 = arith.constant dense<0xFF800000> : vector<8x8xf32>
    %219 = vector.multi_reduction <maximumf>, %218, %cst_85 [2] : vector<8x8x8xf32> to vector<8x8xf32>
    %220 = vector.shape_cast %219 : vector<8x8xf32> to vector<8x8x1xf32>
    %221 = vector.broadcast %220 : vector<8x8x1xf32> to vector<8x8x8xf32>
    %222 = arith.subf %218, %221 : vector<8x8x8xf32>
    %223 = math.exp %222 : vector<8x8x8xf32>
    %cst_86 = arith.constant dense<0.000000e+00> : vector<8x8xf32>
    %224 = vector.multi_reduction <add>, %223, %cst_86 [2] : vector<8x8x8xf32> to vector<8x8xf32>
    %225 = vector.shape_cast %224 : vector<8x8xf32> to vector<8x8x1xf32>
    %226 = tpu.reciprocal %225 {approx = true} : vector<8x8x1xf32> -> vector<8x8x1xf32>
    %227 = vector.broadcast %226 : vector<8x8x1xf32> to vector<8x8x8xf32>
    %228 = arith.mulf %223, %227 : vector<8x8x8xf32>
    "tpu.trace_start"() <{level = 10 : i32, message = "bqk,bkd->bqd"}> : () -> ()
    %cst_87 = arith.constant dense<0.000000e+00> : vector<8x8x8xf32>
    %229 = tpu.matmul %228, %214, %cst_87 {dimension_numbers = #tpu.dot_dimension_numbers<[2], [1], [1], [2], [0, 0, 0, 1, 1, 2], [0], [0]>} : vector<8x8x8xf32>, vector<8x8x8xf32>, vector<8x8x8xf32> -> vector<8x8x8xf32>
    "tpu.trace_stop"() : () -> ()
    %230 = vector.extract_strided_slice %229 {offsets = [0, 0, 0], sizes = [2, 8, 8], strides = [1, 1, 1]} : vector<8x8x8xf32> to vector<2x8x8xf32>
    %231 = vector.extract_strided_slice %229 {offsets = [2, 0, 0], sizes = [2, 8, 8], strides = [1, 1, 1]} : vector<8x8x8xf32> to vector<2x8x8xf32>
    %232 = vector.extract_strided_slice %229 {offsets = [4, 0, 0], sizes = [2, 8, 8], strides = [1, 1, 1]} : vector<8x8x8xf32> to vector<2x8x8xf32>
    %233 = vector.extract_strided_slice %229 {offsets = [6, 0, 0], sizes = [2, 8, 8], strides = [1, 1, 1]} : vector<8x8x8xf32> to vector<2x8x8xf32>
    %234 = tpu.concatenate %230, %231, %232, %233 in 2 : vector<2x8x8xf32>, vector<2x8x8xf32>, vector<2x8x8xf32>, vector<2x8x8xf32> -> vector<2x8x32xf32>
    %235 = vector.shape_cast %234 : vector<2x8x32xf32> to vector<16x32xf32>
    %c1_88 = arith.constant 1 : index
    %c0_89 = arith.constant 0 : index
    %c0_90 = arith.constant 0 : index
    %236 = vector.load %arg7[%c1_88, %c0_89, %c0_90] : memref<2x32x32xf32, #tpu.memory_space<vmem>>, vector<1x32x32xf32>
    %237 = vector.shape_cast %236 : vector<1x32x32xf32> to vector<32x32xf32>
    %cst_91 = arith.constant dense<0.000000e+00> : vector<16x32xf32>
    %238 = tpu.matmul %235, %237, %cst_91 {dimension_numbers = #tpu.dot_dimension_numbers<[1], [0], [0], [1], [0, 0, 1, 1], [], []>} : vector<16x32xf32>, vector<32x32xf32>, vector<16x32xf32> -> vector<16x32xf32>
    %c1_92 = arith.constant 1 : index
    %c0_93 = arith.constant 0 : index
    %c0_94 = arith.constant 0 : index
    %239 = vector.load %arg8[%c1_92, %c0_93, %c0_94] : memref<2x1x32xf32, #tpu.memory_space<vmem>>, vector<1x1x32xf32>
    %240 = vector.shape_cast %239 : vector<1x1x32xf32> to vector<1x32xf32>
    %241 = vector.broadcast %240 : vector<1x32xf32> to vector<16x32xf32>
    %242 = arith.addf %238, %241 : vector<16x32xf32>
    %243 = arith.addf %160, %242 : vector<16x32xf32>
    %c1_95 = arith.constant 1 : index
    %c0_96 = arith.constant 0 : index
    %c0_97 = arith.constant 0 : index
    %244 = vector.load %arg9[%c1_95, %c0_96, %c0_97] : memref<2x1x32xf32, #tpu.memory_space<vmem>>, vector<1x1x32xf32>
    %245 = vector.shape_cast %244 : vector<1x1x32xf32> to vector<1x32xf32>
    %c1_98 = arith.constant 1 : index
    %c0_99 = arith.constant 0 : index
    %c0_100 = arith.constant 0 : index
    %246 = vector.load %arg10[%c1_98, %c0_99, %c0_100] : memref<2x1x32xf32, #tpu.memory_space<vmem>>, vector<1x1x32xf32>
    %247 = vector.shape_cast %246 : vector<1x1x32xf32> to vector<1x32xf32>
    %cst_101 = arith.constant dense<0.000000e+00> : vector<16xf32>
    %248 = vector.multi_reduction <add>, %243, %cst_101 [1] : vector<16x32xf32> to vector<16xf32>
    %249 = vector.shape_cast %248 : vector<16xf32> to vector<16x1xf32>
    %cst_102 = arith.constant 3.200000e+01 : f32
    %250 = vector.broadcast %cst_102 : f32 to vector<16x1xf32>
    %251 = arith.divf %249, %250 : vector<16x1xf32>
    %252 = vector.broadcast %251 : vector<16x1xf32> to vector<16x32xf32>
    %253 = arith.subf %243, %252 : vector<16x32xf32>
    %254 = arith.mulf %253, %253 : vector<16x32xf32>
    %cst_103 = arith.constant dense<0.000000e+00> : vector<16xf32>
    %255 = vector.multi_reduction <add>, %254, %cst_103 [1] : vector<16x32xf32> to vector<16xf32>
    %256 = vector.shape_cast %255 : vector<16xf32> to vector<16x1xf32>
    %cst_104 = arith.constant 3.200000e+01 : f32
    %257 = vector.broadcast %cst_104 : f32 to vector<16x1xf32>
    %258 = arith.divf %256, %257 : vector<16x1xf32>
    %259 = vector.broadcast %251 : vector<16x1xf32> to vector<16x32xf32>
    %260 = arith.subf %243, %259 : vector<16x32xf32>
    %cst_105 = arith.constant 9.99999974E-6 : f32
    %261 = vector.broadcast %cst_105 : f32 to vector<16x1xf32>
    %262 = arith.addf %258, %261 : vector<16x1xf32>
    %263 = math.rsqrt %262 : vector<16x1xf32>
    %264 = vector.broadcast %263 : vector<16x1xf32> to vector<16x32xf32>
    %265 = arith.mulf %260, %264 : vector<16x32xf32>
    %266 = vector.broadcast %245 : vector<1x32xf32> to vector<16x32xf32>
    %267 = arith.mulf %265, %266 : vector<16x32xf32>
    %268 = vector.broadcast %247 : vector<1x32xf32> to vector<16x32xf32>
    %269 = arith.addf %267, %268 : vector<16x32xf32>
    %c1_106 = arith.constant 1 : index
    %c0_107 = arith.constant 0 : index
    %c0_108 = arith.constant 0 : index
    %270 = vector.load %arg11[%c1_106, %c0_107, %c0_108] : memref<2x32x32xf32, #tpu.memory_space<vmem>>, vector<1x32x32xf32>
    %271 = vector.shape_cast %270 : vector<1x32x32xf32> to vector<32x32xf32>
    %cst_109 = arith.constant dense<0.000000e+00> : vector<16x32xf32>
    %272 = tpu.matmul %269, %271, %cst_109 {dimension_numbers = #tpu.dot_dimension_numbers<[1], [0], [0], [1], [0, 0, 1, 1], [], []>} : vector<16x32xf32>, vector<32x32xf32>, vector<16x32xf32> -> vector<16x32xf32>
    %c1_110 = arith.constant 1 : index
    %c0_111 = arith.constant 0 : index
    %c0_112 = arith.constant 0 : index
    %273 = vector.load %arg12[%c1_110, %c0_111, %c0_112] : memref<2x1x32xf32, #tpu.memory_space<vmem>>, vector<1x1x32xf32>
    %274 = vector.shape_cast %273 : vector<1x1x32xf32> to vector<1x32xf32>
    %275 = vector.broadcast %274 : vector<1x32xf32> to vector<16x32xf32>
    %276 = arith.addf %272, %275 : vector<16x32xf32>
    %cst_113 = arith.constant 5.000000e-01 : f32
    %277 = vector.broadcast %cst_113 : f32 to vector<16x32xf32>
    %278 = arith.mulf %277, %276 : vector<16x32xf32>
    %cst_114 = arith.constant 0.636619746 : f32
    %279 = math.sqrt %cst_114 : f32
    %cst_115 = arith.constant 4.471500e-02 : f32
    %280 = vector.broadcast %cst_115 : f32 to vector<16x32xf32>
    %281 = arith.mulf %280, %276 : vector<16x32xf32>
    %282 = arith.mulf %281, %276 : vector<16x32xf32>
    %283 = arith.mulf %282, %276 : vector<16x32xf32>
    %284 = arith.addf %276, %283 : vector<16x32xf32>
    %285 = vector.broadcast %279 : f32 to vector<16x32xf32>
    %286 = arith.mulf %285, %284 : vector<16x32xf32>
    %287 = math.tanh %286 : vector<16x32xf32>
    %cst_116 = arith.constant 1.000000e+00 : f32
    %288 = vector.broadcast %cst_116 : f32 to vector<16x32xf32>
    %289 = arith.addf %288, %287 : vector<16x32xf32>
    %290 = arith.mulf %278, %289 : vector<16x32xf32>
    %c1_117 = arith.constant 1 : index
    %c0_118 = arith.constant 0 : index
    %c0_119 = arith.constant 0 : index
    %291 = vector.load %arg13[%c1_117, %c0_118, %c0_119] : memref<2x32x32xf32, #tpu.memory_space<vmem>>, vector<1x32x32xf32>
    %292 = vector.shape_cast %291 : vector<1x32x32xf32> to vector<32x32xf32>
    %cst_120 = arith.constant dense<0.000000e+00> : vector<16x32xf32>
    %293 = tpu.matmul %290, %292, %cst_120 {dimension_numbers = #tpu.dot_dimension_numbers<[1], [0], [0], [1], [0, 0, 1, 1], [], []>} : vector<16x32xf32>, vector<32x32xf32>, vector<16x32xf32> -> vector<16x32xf32>
    %c1_121 = arith.constant 1 : index
    %c0_122 = arith.constant 0 : index
    %c0_123 = arith.constant 0 : index
    %294 = vector.load %arg14[%c1_121, %c0_122, %c0_123] : memref<2x1x32xf32, #tpu.memory_space<vmem>>, vector<1x1x32xf32>
    %295 = vector.shape_cast %294 : vector<1x1x32xf32> to vector<1x32xf32>
    %296 = vector.broadcast %295 : vector<1x32xf32> to vector<16x32xf32>
    %297 = arith.addf %293, %296 : vector<16x32xf32>
    %298 = arith.addf %243, %297 : vector<16x32xf32>
    %c0_124 = arith.constant 0 : index
    %c0_125 = arith.constant 0 : index
    %299 = vector.load %arg15[%c0_124, %c0_125] : memref<1x32xf32, #tpu.memory_space<vmem>>, vector<1x32xf32>
    %c0_126 = arith.constant 0 : index
    %c0_127 = arith.constant 0 : index
    %300 = vector.load %arg16[%c0_126, %c0_127] : memref<1x32xf32, #tpu.memory_space<vmem>>, vector<1x32xf32>
    %cst_128 = arith.constant dense<0.000000e+00> : vector<16xf32>
    %301 = vector.multi_reduction <add>, %298, %cst_128 [1] : vector<16x32xf32> to vector<16xf32>
    %302 = vector.shape_cast %301 : vector<16xf32> to vector<16x1xf32>
    %cst_129 = arith.constant 3.200000e+01 : f32
    %303 = vector.broadcast %cst_129 : f32 to vector<16x1xf32>
    %304 = arith.divf %302, %303 : vector<16x1xf32>
    %305 = vector.broadcast %304 : vector<16x1xf32> to vector<16x32xf32>
    %306 = arith.subf %298, %305 : vector<16x32xf32>
    %307 = arith.mulf %306, %306 : vector<16x32xf32>
    %cst_130 = arith.constant dense<0.000000e+00> : vector<16xf32>
    %308 = vector.multi_reduction <add>, %307, %cst_130 [1] : vector<16x32xf32> to vector<16xf32>
    %309 = vector.shape_cast %308 : vector<16xf32> to vector<16x1xf32>
    %cst_131 = arith.constant 3.200000e+01 : f32
    %310 = vector.broadcast %cst_131 : f32 to vector<16x1xf32>
    %311 = arith.divf %309, %310 : vector<16x1xf32>
    %312 = vector.broadcast %304 : vector<16x1xf32> to vector<16x32xf32>
    %313 = arith.subf %298, %312 : vector<16x32xf32>
    %cst_132 = arith.constant 9.99999974E-6 : f32
    %314 = vector.broadcast %cst_132 : f32 to vector<16x1xf32>
    %315 = arith.addf %311, %314 : vector<16x1xf32>
    %316 = math.rsqrt %315 : vector<16x1xf32>
    %317 = vector.broadcast %316 : vector<16x1xf32> to vector<16x32xf32>
    %318 = arith.mulf %313, %317 : vector<16x32xf32>
    %319 = vector.broadcast %299 : vector<1x32xf32> to vector<16x32xf32>
    %320 = arith.mulf %318, %319 : vector<16x32xf32>
    %321 = vector.broadcast %300 : vector<1x32xf32> to vector<16x32xf32>
    %322 = arith.addf %320, %321 : vector<16x32xf32>
    %c0_133 = arith.constant 0 : index
    %c0_134 = arith.constant 0 : index
    %323 = vector.load %arg17[%c0_133, %c0_134] : memref<16x32xf32, #tpu.memory_space<vmem>>, vector<16x32xf32>
    tpu.vector_store %arg17[%c0_133, %c0_134], %322 {strides = array<i32>} : memref<16x32xf32, #tpu.memory_space<vmem>>, vector<16x32xf32>,
    return
  }
}

</mosaic_0001>

<bundles_post_ra>
// kernel: tpu_custom_call.1
= control target key start
LH: loop header
LB: loop body
LE: loop exit
PB: predicated region body
PF: predicated region fallthrough
CT: control target
= control target key end

     0   :  { %s5815_s0 = inlined_call_operand.vmem [shape: s32[16,1], index: 0, kind: input, shape index: {}]   ;;  %s5816_s1 = inlined_call_operand.hbm [shape: f32[16,32], index: 1, kind: input, shape index: {}]   ;;  %s5817_s2 = inlined_call_operand.hbm [shape: f32[8,32], index: 2, kind: input, shape index: {}]   ;;  %s5818_s3 = inlined_call_operand.vmem [shape: f32[2,1,32], index: 3, kind: input, shape index: {}]   ;;  %s5819_s4 = inlined_call_operand.hbm [shape: f32[2,1,32], index: 4, kind: input, shape index: {}]   ;;  %s5820_s5 = inlined_call_operand.hbm [shape: f32[2,32,96], index: 5, kind: input, shape index: {}]   ;;  %s5821_s6 = inlined_call_operand.hbm [shape: f32[2,1,96], index: 6, kind: input, shape index: {}]   ;;  %s5822_s7 = inlined_call_operand.hbm [shape: f32[2,32,32], index: 7, kind: input, shape index: {}]   ;;  %s5823_s8 = inlined_call_operand.hbm [shape: f32[2,1,32], index: 8, kind: input, shape index: {}]   ;;  %s5824_s9 = inlined_call_operand.hbm [shape: f32[2,1,32], index: 9, kind: input, shape index: {}]   ;;  %s5825_s10 = inlined_call_operand.hbm [shape: f32[2,1,32], index: 10, kind: input, shape index: {}]   ;;  %s5826_s11 = inlined_call_operand.hbm [shape: f32[2,32,32], index: 11, kind: input, shape index: {}]   ;;  %s5827_s12 = inlined_call_operand.hbm [shape: f32[2,1,32], index: 12, kind: input, shape index: {}]   ;;  %s5828_s13 = inlined_call_operand.vmem [shape: f32[2,32,32], index: 13, kind: input, shape index: {}]   ;;  %s5829_s14 = inlined_call_operand.vmem [shape: f32[2,1,32], index: 14, kind: input, shape index: {}]   ;;  %s5830_s15 = inlined_call_operand.vmem [shape: f32[1,32], index: 15, kind: input, shape index: {}]   ;;  %s5831_s16 = inlined_call_operand.vmem [shape: f32[1,32], index: 16, kind: input, shape index: {}]   ;;  %s5832_s17 = inlined_call_operand.hbm [shape: f32[16,32], index: 17, kind: output, shape index: {}]  }
   0x1   :  { %5835 = sst [smem:[#allocation28_spill]] %s5815_s0 }
   0x2   :  { %5836 = sst [smem:[#allocation29_spill]] %s5816_s1 }
   0x3   :  { %22 = vsyncpa [#allocation3], 0 }
   0x4   :  { %23 = vsyncpa [#allocation6], 0 }
   0x5   :  { %24 = vsyncpa [#allocation9], 0 }
   0x6   :  { %25 = vsyncpa [#allocation12], 0 }
   0x7   :  { %26 = vsyncpa [#allocation15], 0 }
   0x8   :  { %27 = vsyncpa [#allocation18], 0 }
   0x9   :  { %28 = vsyncpa [#allocation4], 0  ;;  %s5007_s24 = smov [#allocation5]   ;;  %s4729_s28 = scalar_lea.hbm %s5817_s2, 128 }
   0xa   :  { %s49_s25 = sshll.u32 %s5007_s24, 4  ;;  %p4730_p0 = scmp.ne.s32.totalorder %s5817_s2, %s4729_s28  ;;  %s50_s25 = int_to_ptr.vmem [resolvable:$true] %s49_s25 }
   0xb   :  { %p4733_p1 = scmp.lt.u32.totalorder %s4729_s28, %s5817_s2 }
   0xd   :  { %p4735_p2 = pnand %p4733_p1, %p4730_p0 }
   0xf   :  { %4738 = shalt.err (!%p4735_p2)
}
  0x10   :  { %s4739_s19 = scalar_lea.vmem %s50_s25, 128  ;;  %p4744_p4 = scmp.lt.s32.totalorder %s50_s25, %s50_s25 }
  0x11   :  { %p4740_p3 = scmp.ne.s32.totalorder %s50_s25, %s4739_s19  ;;  %p4745_p5 = scmp.lt.s32.totalorder %s4739_s19, %s4739_s19 }
  0x13   :  { %p4746_p6 = por %p4745_p5, %p4744_p4 }
  0x15   :  { %p4747_p7 = pnand %p4746_p6, %p4740_p3 }
  0x17   :  { %4750 = shalt.err (!%p4747_p7)
}
  0x18   :  { %52 = dma.hbm_to_vmem [thread:$0]  %s5817_s2, 128, %s50_s25, [#allocation6]  }
  0x19   :  { %s5008_s21 = smov [#allocation8]   ;;  %s5009_s23 = smov [#allocation11]  }
  0x1a   :  { %s72_s22 = sshll.u32 %s5008_s21, 4  ;;  %s96_s24 = sshll.u32 %s5009_s23, 4  ;;  %s73_s22 = int_to_ptr.vmem [resolvable:$true] %s72_s22  ;;  %s97_s24 = int_to_ptr.vmem [resolvable:$true] %s96_s24 }
  0x1b   :  { %s4751_s28 = scalar_lea.hbm %s5820_s5, 1024 }
  0x1c   :  { %p4752_p8 = scmp.ne.s32.totalorder %s5820_s5, %s4751_s28  ;;  %p4755_p9 = scmp.lt.u32.totalorder %s4751_s28, %s5820_s5 }
  0x1e   :  { %p4757_p10 = pnand %p4755_p9, %p4752_p8 }
  0x20   :  { %4760 = shalt.err (!%p4757_p10)
}
  0x21   :  { %s4761_s2 = scalar_lea.vmem %s73_s22, 1024  ;;  %p4766_p12 = scmp.lt.s32.totalorder %s73_s22, %s73_s22 }
  0x22   :  { %p4762_p11 = scmp.ne.s32.totalorder %s73_s22, %s4761_s2  ;;  %p4767_p13 = scmp.lt.s32.totalorder %s4761_s2, %s4761_s2 }
  0x24   :  { %p4768_p0 = por %p4767_p13, %p4766_p12 }
  0x26   :  { %p4769_p1 = pnand %p4768_p0, %p4762_p11 }
  0x28   :  { %4772 = shalt.err (!%p4769_p1)
}
  0x29   :  { %s5010_s25 = smov 128   ;;  %s5011_s19 = smov 8  }
  0x2a   :  { %78 = dma.hbm_to_vmem [thread:$0]  %s5820_s5, 1024, %s73_s22, [#allocation9], %s5010_s25, %s5010_s25, %s5011_s19  }
  0x2b   :  { %s4773_s26 = scalar_lea.hbm %s5822_s7, 1024 }
  0x2c   :  { %p4774_p2 = scmp.ne.s32.totalorder %s5822_s7, %s4773_s26  ;;  %p4777_p3 = scmp.lt.u32.totalorder %s4773_s26, %s5822_s7 }
  0x2e   :  { %p4779_p4 = pnand %p4777_p3, %p4774_p2 }
  0x30   :  { %4782 = shalt.err (!%p4779_p4)
}
  0x31   :  { %s4783_s30 = scalar_lea.vmem %s97_s24, 1024  ;;  %p4788_p6 = scmp.lt.s32.totalorder %s97_s24, %s97_s24 }
  0x32   :  { %p4784_p5 = scmp.ne.s32.totalorder %s97_s24, %s4783_s30  ;;  %p4789_p7 = scmp.lt.s32.totalorder %s4783_s30, %s4783_s30 }
  0x34   :  { %p4790_p8 = por %p4789_p7, %p4788_p6 }
  0x36   :  { %p4791_p9 = pnand %p4790_p8, %p4784_p5 }
  0x38   :  { %4794 = shalt.err (!%p4791_p9)
}
  0x39   :  { %102 = dma.hbm_to_vmem [thread:$0]  %s5822_s7, 1024, %s97_s24, [#allocation12], %s5010_s25, %s5010_s25, %s5011_s19  }
  0x3a   :  { %s5012_s18 = smov [#allocation14]   ;;  %s5013_s1 = smov [#allocation17]  }
  0x3b   :  { %s120_s2 = sshll.u32 %s5012_s18, 4  ;;  %s144_s20 = sshll.u32 %s5013_s1, 4  ;;  %s121_s2 = int_to_ptr.vmem [resolvable:$true] %s120_s2  ;;  %s145_s20 = int_to_ptr.vmem [resolvable:$true] %s144_s20 }
  0x3c   :  { %s4795_s26 = scalar_lea.hbm %s5824_s9, 32 }
  0x3d   :  { %p4796_p10 = scmp.ne.s32.totalorder %s5824_s9, %s4795_s26  ;;  %p4799_p11 = scmp.lt.u32.totalorder %s4795_s26, %s5824_s9 }
  0x3f   :  { %p4801_p12 = pnand %p4799_p11, %p4796_p10 }
  0x41   :  { %4804 = shalt.err (!%p4801_p12)
}
  0x42   :  { %s4805_s7 = scalar_lea.vmem %s121_s2, 32  ;;  %p4810_p0 = scmp.lt.s32.totalorder %s121_s2, %s121_s2 }
  0x43   :  { %p4806_p13 = scmp.ne.s32.totalorder %s121_s2, %s4805_s7  ;;  %p4811_p1 = scmp.lt.s32.totalorder %s4805_s7, %s4805_s7 }
  0x45   :  { %p4812_p2 = por %p4811_p1, %p4810_p0 }
  0x47   :  { %p4813_p3 = pnand %p4812_p2, %p4806_p13 }
  0x49   :  { %4816 = shalt.err (!%p4813_p3)
}
  0x4a   :  { %s5014_s24 = smov 16   ;;  %s5015_s30 = smov 1  }
  0x4b   :  { %126 = dma.hbm_to_vmem [thread:$0]  %s5824_s9, 32, %s121_s2, [#allocation15], %s5014_s24, %s5014_s24, %s5015_s30  }
  0x4c   :  { %s4817_s21 = scalar_lea.hbm %s5826_s11, 1024 }
  0x4d   :  { %p4818_p4 = scmp.ne.s32.totalorder %s5826_s11, %s4817_s21  ;;  %p4821_p5 = scmp.lt.u32.totalorder %s4817_s21, %s5826_s11 }
  0x4f   :  { %p4823_p6 = pnand %p4821_p5, %p4818_p4 }
  0x51   :  { %4826 = shalt.err (!%p4823_p6)
}
  0x52   :  { %s4827_s29 = scalar_lea.vmem %s145_s20, 1024  ;;  %p4832_p8 = scmp.lt.s32.totalorder %s145_s20, %s145_s20 }
  0x53   :  { %p4828_p7 = scmp.ne.s32.totalorder %s145_s20, %s4827_s29  ;;  %p4833_p9 = scmp.lt.s32.totalorder %s4827_s29, %s4827_s29 }
  0x55   :  { %p4834_p10 = por %p4833_p9, %p4832_p8 }
  0x57   :  { %p4835_p11 = pnand %p4834_p10, %p4828_p7 }
  0x59   :  { %4838 = shalt.err (!%p4835_p11)
}
  0x5a   :  { %150 = dma.hbm_to_vmem [thread:$0]  %s5826_s11, 1024, %s145_s20, [#allocation18], %s5010_s25, %s5010_s25, %s5011_s19  }
  0x5b   :  { %s5016_s0 = smov [#allocation2]   ;;  %s5017_s5 = smov [#allocation7]  }
  0x5c   :  { %s36_s7 = sshll.u32 %s5016_s0, 4  ;;  %s60_s22 = sshll.u32 %s5017_s5, 4  ;;  %s37_s7 = int_to_ptr.vmem [resolvable:$true] %s36_s7  ;;  %s61_s22 = int_to_ptr.vmem [resolvable:$true] %s60_s22 }
  0x5d   :  { %s5837_s21 = sld [smem:[#allocation29_spill]] }
  0x63   :  { %s4839_s23 = scalar_lea.hbm %s5837_s21, 256 }
  0x64   :  { %p4840_p12 = scmp.ne.s32.totalorder %s5837_s21, %s4839_s23  ;;  %p4843_p13 = scmp.lt.u32.totalorder %s4839_s23, %s5837_s21 }
  0x66   :  { %p4845_p0 = pnand %p4843_p13, %p4840_p12 }
  0x68   :  { %4848 = shalt.err (!%p4845_p0)
}
  0x69   :  { %s4849_s11 = scalar_lea.vmem %s37_s7, 256  ;;  %p4854_p2 = scmp.lt.s32.totalorder %s37_s7, %s37_s7 }
  0x6a   :  { %p4850_p1 = scmp.ne.s32.totalorder %s37_s7, %s4849_s11  ;;  %p4855_p3 = scmp.lt.s32.totalorder %s4849_s11, %s4849_s11 }
  0x6c   :  { %p4856_p4 = por %p4855_p3, %p4854_p2 }
  0x6e   :  { %p4857_p5 = pnand %p4856_p4, %p4850_p1 }
  0x70   :  { %4860 = shalt.err (!%p4857_p5)
}
  0x71   :  { %42 = dma.hbm_to_vmem [thread:$0]  %s5837_s21, 256, %s37_s7, [#allocation3], %s5010_s25, %s5010_s25, %s5011_s19  }
  0x72   :  { %s4861_s5 = scalar_lea.hbm %s5819_s4, 32 }
  0x73   :  { %p4862_p6 = scmp.ne.s32.totalorder %s5819_s4, %s4861_s5  ;;  %p4865_p7 = scmp.lt.u32.totalorder %s4861_s5, %s5819_s4 }
  0x75   :  { %p4867_p8 = pnand %p4865_p7, %p4862_p6 }
  0x77   :  { %4870 = shalt.err (!%p4867_p8)
}
  0x78   :  { %s4871_s27 = scalar_lea.vmem %s61_s22, 32  ;;  %p4876_p10 = scmp.lt.s32.totalorder %s61_s22, %s61_s22 }
  0x79   :  { %p4872_p9 = scmp.ne.s32.totalorder %s61_s22, %s4871_s27  ;;  %p4877_p11 = scmp.lt.s32.totalorder %s4871_s27, %s4871_s27 }
  0x7b   :  { %p4878_p12 = por %p4877_p11, %p4876_p10 }
  0x7d   :  { %p4879_p13 = pnand %p4878_p12, %p4872_p9 }
  0x7f   :  { %4882 = shalt.err (!%p4879_p13)
}
  0x80   :  { %66 = dma.hbm_to_vmem [thread:$0]  %s5819_s4, 32, %s61_s22, [#allocation6], %s5014_s24, %s5014_s24, %s5015_s30  }
  0x81   :  { %s5018_s28 = smov [#allocation10]   ;;  %s5019_s11 = smov [#allocation13]  }
  0x82   :  { %s84_s29 = sshll.u32 %s5018_s28, 4  ;;  %s108_s20 = sshll.u32 %s5019_s11, 4  ;;  %s85_s29 = int_to_ptr.vmem [resolvable:$true] %s84_s29  ;;  %s109_s20 = int_to_ptr.vmem [resolvable:$true] %s108_s20 }
  0x83   :  { %s4883_s0 = scalar_lea.hbm %s5821_s6, 32 }
  0x84   :  { %p4884_p0 = scmp.ne.s32.totalorder %s5821_s6, %s4883_s0  ;;  %p4887_p1 = scmp.lt.u32.totalorder %s4883_s0, %s5821_s6 }
  0x86   :  { %p4889_p2 = pnand %p4887_p1, %p4884_p0 }
  0x88   :  { %4892 = shalt.err (!%p4889_p2)
}
  0x89   :  { %s4893_s4 = scalar_lea.vmem %s85_s29, 32  ;;  %p4898_p4 = scmp.lt.s32.totalorder %s85_s29, %s85_s29 }
  0x8a   :  { %p4894_p3 = scmp.ne.s32.totalorder %s85_s29, %s4893_s4  ;;  %p4899_p5 = scmp.lt.s32.totalorder %s4893_s4, %s4893_s4 }
  0x8c   :  { %p4900_p6 = por %p4899_p5, %p4898_p4 }
  0x8e   :  { %p4901_p7 = pnand %p4900_p6, %p4894_p3 }
  0x90   :  { %4904 = shalt.err (!%p4901_p7)
}
  0x91   :  { %90 = dma.hbm_to_vmem [thread:$0]  %s5821_s6, 32, %s85_s29, [#allocation9], %s5014_s24, %s5014_s24, %s5015_s30  }
  0x92   :  { %s4905_s21 = scalar_lea.hbm %s5823_s8, 32 }
  0x93   :  { %p4906_p8 = scmp.ne.s32.totalorder %s5823_s8, %s4905_s21  ;;  %p4909_p9 = scmp.lt.u32.totalorder %s4905_s21, %s5823_s8 }
  0x95   :  { %p4911_p10 = pnand %p4909_p9, %p4906_p8 }
  0x97   :  { %4914 = shalt.err (!%p4911_p10)
}
  0x98   :  { %s4915_s0 = scalar_lea.vmem %s109_s20, 32  ;;  %p4920_p12 = scmp.lt.s32.totalorder %s109_s20, %s109_s20 }
  0x99   :  { %p4916_p11 = scmp.ne.s32.totalorder %s109_s20, %s4915_s0  ;;  %p4921_p13 = scmp.lt.s32.totalorder %s4915_s0, %s4915_s0 }
  0x9b   :  { %p4922_p0 = por %p4921_p13, %p4920_p12 }
  0x9d   :  { %p4923_p1 = pnand %p4922_p0, %p4916_p11 }
  0x9f   :  { %4926 = shalt.err (!%p4923_p1)
}
  0xa0   :  { %114 = dma.hbm_to_vmem [thread:$0]  %s5823_s8, 32, %s109_s20, [#allocation12], %s5014_s24, %s5014_s24, %s5015_s30  }
  0xa1   :  { %s5020_s5 = smov [#allocation16]   ;;  %s5021_s1 = smov [#allocation19]  }
  0xa2   :  { %s132_s18 = sshll.u32 %s5020_s5, 4  ;;  %s156_s23 = sshll.u32 %s5021_s1, 4  ;;  %s133_s18 = int_to_ptr.vmem [resolvable:$true] %s132_s18  ;;  %s157_s23 = int_to_ptr.vmem [resolvable:$true] %s156_s23 }
  0xa3   :  { %s4927_s26 = scalar_lea.hbm %s5825_s10, 32 }
  0xa4   :  { %p4928_p2 = scmp.ne.s32.totalorder %s5825_s10, %s4927_s26  ;;  %p4931_p3 = scmp.lt.u32.totalorder %s4927_s26, %s5825_s10 }
  0xa6   :  { %p4933_p4 = pnand %p4931_p3, %p4928_p2 }
  0xa8   :  { %4936 = shalt.err (!%p4933_p4)
}
  0xa9   :  { %s4937_s8 = scalar_lea.vmem %s133_s18, 32  ;;  %p4942_p6 = scmp.lt.s32.totalorder %s133_s18, %s133_s18 }
  0xaa   :  { %p4938_p5 = scmp.ne.s32.totalorder %s133_s18, %s4937_s8  ;;  %p4943_p7 = scmp.lt.s32.totalorder %s4937_s8, %s4937_s8 }
  0xac   :  { %p4944_p8 = por %p4943_p7, %p4942_p6 }
  0xae   :  { %p4945_p9 = pnand %p4944_p8, %p4938_p5 }
  0xb0   :  { %4948 = shalt.err (!%p4945_p9)
}
  0xb1   :  { %138 = dma.hbm_to_vmem [thread:$0]  %s5825_s10, 32, %s133_s18, [#allocation15], %s5014_s24, %s5014_s24, %s5015_s30  }
  0xb2   :  { %s4949_s0 = scalar_lea.hbm %s5827_s12, 32 }
  0xb3   :  { %p4950_p10 = scmp.ne.s32.totalorder %s5827_s12, %s4949_s0  ;;  %p4953_p11 = scmp.lt.u32.totalorder %s4949_s0, %s5827_s12 }
  0xb5   :  { %p4955_p12 = pnand %p4953_p11, %p4950_p10 }
  0xb7   :  { %4958 = shalt.err (!%p4955_p12)
}
  0xb8   :  { %s4959_s4 = scalar_lea.vmem %s157_s23, 32  ;;  %p4964_p0 = scmp.lt.s32.totalorder %s157_s23, %s157_s23 }
  0xb9   :  { %p4960_p13 = scmp.ne.s32.totalorder %s157_s23, %s4959_s4  ;;  %p4965_p1 = scmp.lt.s32.totalorder %s4959_s4, %s4959_s4 }
  0xbb   :  { %p4966_p2 = por %p4965_p1, %p4964_p0 }
  0xbd   :  { %p4967_p3 = pnand %p4966_p2, %p4960_p13 }
  0xbf   :  { %4970 = shalt.err (!%p4967_p3)
}
  0xc0   :  { %162 = dma.hbm_to_vmem [thread:$0]  %s5827_s12, 32, %s157_s23, [#allocation18], %s5014_s24, %s5014_s24, %s5015_s30  }
  0xc1   :  { %4993 = dma.done.wait [#allocation3], 256  }
  0xc2   :  { %4994 = vsyncadd [#allocation3], 4294967040 }
  0xc3   :  { %4995 = dma.done.wait [#allocation6], 160  }
  0xc4   :  { %4996 = vsyncadd [#allocation6], 4294967136 }
  0xc5   :  { %4997 = dma.done.wait [#allocation9], 1056  }
  0xc6   :  { %4998 = vsyncadd [#allocation9], 4294966240 }
  0xc7   :  { %4999 = dma.done.wait [#allocation12], 1056  }
  0xc8   :  { %5000 = vsyncadd [#allocation12], 4294966240 }
  0xc9   :  { %5001 = dma.done.wait [#allocation15], 64  }
  0xca   :  { %5002 = vsyncadd [#allocation15], 4294967232 }
  0xcb   :  { %5003 = dma.done.wait [#allocation18], 1056  }
  0xcc   :  { %5004 = vsyncadd [#allocation18], 4294966240  ;;  %v5022_v0 = vmov 0   ;;  %s5838_s27 = sld [smem:[#allocation28_spill]]  ;;  %v220_v2 = vld [vmem:[#allocation2] sm:$0xff]  ;;  %v221_v3 = vld [vmem:[#allocation2 + $0x8] sm:$0xff]  ;;  %v206_v7 = vlaneseq }
  0xcd   :  { %4636 = vset.pattern.permute.xlu0 %v5022_v0  ;;  %v4542_v5 = vpack.c.bf16 %v221_v3, %v220_v2  ;;  %v5023_v6 = vmov 0.0   ;;  %vm222_vm0 = vcmask 130048   ;;  %v304_v13 = vld [vmem:[#allocation5] sm:$0xff]  ;;  %vm313_vm3 = vcmask 261120   ;;  %v357_v30 = vld [vmem:[#allocation8] sm:$0xff]  ;;  %v358_v31 = vld [vmem:[#allocation8 + $0x8] sm:$0xff] }
  0xce   :  { %v5293_v8 = vand.u32 127, %v206_v7  ;;  %v359_v32 = vld [vmem:[#allocation8 + $0x10] sm:$0xff]  ;;  %v4546_v33 = vpack.c.bf16 %v358_v31, %v357_v30  ;;  %v360_v34 = vld [vmem:[#allocation8 + $0x18] sm:$0xff]  ;;  %v4083_v43 = vld [vmem:[%s5818_s3] ss:$0 sm:$0xff]  ;;  %s5024_s21 = smov 120  }
  0xcf   :  { %4543 = vmatprep.subr.bf16.mxu0 %v4542_v5  ;;  %v4550_v35 = vpack.c.bf16 %v360_v34, %v359_v32  ;;  %v4084_v45 = vld [vmem:[#allocation7] ss:$0 sm:$0xff]  ;;  %v4085_v52 = vld [vmem:[#allocation10] ss:$0 sm:$0xff]  ;;  %s5025_s28 = smov 104   ;;  %s5026_s8 = smov 112  }
  0xd0   :  { %4545 = vmatpush3.bf16.msra.mxu0 %v4542_v5  ;;  %4547 = vmatprep.subr.bf16.mxu1 %v4546_v33  ;;  %vm5027_vm4 = vmmov 0   ;;  %s5028_s20 = smov 96   ;;  %vm465_vm5 = vcmask 64512   ;;  %s5030_s11 = smov 64   ;;  %vm1812_vm7 = vcmask 195584  }
  0xd1   :  { %4305 = vmatprep.subr.mxu0 %v5023_v6  ;;  %4549 = vmatpush3.bf16.msra.mxu1 %v4546_v33  ;;  %s5031_s9 = smov 24   ;;  %s5032_s2 = smov [#allocation20]  }
  0xd2   :  { %v204_v1 = vld [vmem:[%s5838_s27] sm:$0xff]  ;;  %v205_v4 = vld [vmem:[%s5838_s27 + $0x8] sm:$0xff]  ;;  %4551 = vmatprep.subr.bf16.mxu1 %v4550_v35  ;;  %s4062_s0 = sshll.u32 %s5032_s2, 4  ;;  %s4063_s0 = int_to_ptr.vmem [resolvable:$true] %s4062_s0 }
  0xd3   :  { %209 = vperm.xlu0 %4636, %v204_v1   ;;  %s4971_s6 = scalar_lea.vmem %s4063_s0, 256  ;;  %p4976_p5 = scmp.lt.s32.totalorder %s4063_s0, %s4063_s0 }
  0xd4   :  { %p4972_p4 = scmp.ne.s32.totalorder %s4063_s0, %s4971_s6  ;;  %p4977_p6 = scmp.lt.s32.totalorder %s4971_s6, %s4971_s6 }
  0xd5   :  { %4553 = vmatpush3.bf16.msra.mxu1 %v4550_v35 }
  0xd6   :  { %4315 = vmatprep.subr.mxu1 %v5023_v6  ;;  %p4978_p7 = por %p4977_p6, %p4976_p5 }
  0xd7   :  { %212 = vperm.xlu0 %4636, %v205_v4  }
  0xd8   :  { %p4979_p8 = pnand %p4978_p7, %p4972_p4 }
 0x152   :  { %v210_v9 = vpop.permute.xlu0 %209 }
 0x153   :  { %vm214_vm1 = vcmp.eq.s32.totalorder %v210_v9, %v5293_v8 }
 0x154   :  { %v4079_v10 = vsel %vm214_vm1, 1.0, %v5023_v6 }
 0x155   :  { %4291 = vmatprep.mubr.msk.f32.mxu0 %vm222_vm0, %v4079_v10  ;;  %v308_v10 = vshrl.u32 %v206_v7, 7 }
 0x156   :  { %v213_v11 = vpop.permute.xlu0 %212 }
 0x157   :  { %vm215_vm2 = vcmp.eq.s32.totalorder %v213_v11, %v5293_v8  ;;  %vm309_vm6 = vcmp.ge.s32.totalorder %v308_v10, %v5293_v8  ;;  %v5029_v11 = vmov -1e+30  }
 0x158   :  { %v4080_v12 = vsel %vm215_vm2, 1.0, %v5023_v6 }
 0x159   :  { %4292 = vmatmul.mubr.msk.f32.vlgmr.msra.gmra.mrb[0].mxu0 %vm222_vm0, %v4080_v12  ;;  %v5417_v12 = vsel %vm309_vm6, 0.0, %v5029_v11 }
 0x15a   :  { %4307 = vmatprep.mubr.msk.f32.mxu0 %vm5027_vm4, %v5023_v6 }
 0x22c   :  { %v4293_v14 = vpop.f32.mrb[0].mxu0 }
 0x22d   :  { %v295_v15 = vpop.f32.mrb[1].mxu0  ;;  %v5303_v17 = vadd.f32 %v4293_v14, %v304_v13 }
 0x22e   :  { %v5301_v16 = vadd.f32 %v304_v13, %v295_v15 }
 0x22f   :  { %v317_v19 = vsel %vm313_vm3, %v5303_v17, 0.0 }
 0x230   :  { %v314_v18 = vsel %vm313_vm3, %v5301_v16, 0.0 }
 0x231   :  { %315 = vadd.xlane.f32.xlu1 %v314_v18 }
 0x235   :  { %318 = vadd.xlane.f32.xlu1 %v317_v19 }
 0x2be   :  { %v316_v20 = vpop.xlane.xlu1 %315 }
 0x2bf   :  { %v321_v21 = vmul.f32 0.03125, %v316_v20 }
 0x2c1   :  { %v323_v22 = vsub.f32 %v5301_v16, %v321_v21 }
 0x2c2   :  { %v319_v23 = vpop.xlane.xlu1 %318 }
 0x2c3   :  { %v322_v24 = vmul.f32 0.03125, %v319_v23  ;;  %v325_v25 = vmul.f32 %v323_v22, %v323_v22 }
 0x2c5   :  { %v324_v26 = vsub.f32 %v5303_v17, %v322_v24  ;;  %v327_v27 = vsel %vm313_vm3, %v325_v25, 0.0 }
 0x2c6   :  { %328 = vadd.xlane.f32.xlu0 %v327_v27 }
 0x2c7   :  { %v326_v28 = vmul.f32 %v324_v26, %v324_v26 }
 0x2c9   :  { %v330_v29 = vsel %vm313_vm3, %v326_v28, 0.0 }
 0x2ca   :  { %331 = vadd.xlane.f32.xlu1 %v330_v29 }
 0x353   :  { %v329_v36 = vpop.xlane.xlu0 %328 }
 0x354   :  { %v333_v37 = vmul.f32 0.03125, %v329_v36 }
 0x356   :  { %v335_v38 = vadd.f32 1e-05, %v333_v37 }
 0x357   :  { %v332_v39 = vpop.xlane.xlu1 %331 }
 0x358   :  { %4637 = vrsqrt.f32 %v335_v38  ;;  %v334_v40 = vmul.f32 0.03125, %v332_v39 }
 0x35a   :  { %v336_v41 = vadd.f32 1e-05, %v334_v40 }
 0x35c   :  { %4639 = vrsqrt.f32 %v336_v41 }
 0x362   :  { %v4638_v42 = vpop.eup %4637 }
 0x363   :  { %v339_v44 = vmul.f32 %v4638_v42, %v323_v22 }
 0x365   :  { %v347_v46 = vmul.f32 %v4083_v43, %v339_v44 }
 0x366   :  { %v4640_v47 = vpop.eup %4639 }
 0x367   :  { %v340_v48 = vmul.f32 %v4640_v47, %v324_v26  ;;  %v355_v49 = vadd.f32 %v4084_v45, %v347_v46 }
 0x369   :  { %v348_v50 = vmul.f32 %v4083_v43, %v340_v48  ;;  %4302 = vmatprep.mubr.msk.f32.mxu1 %vm313_vm3, %v355_v49 }
 0x36b   :  { %v356_v51 = vadd.f32 %v4084_v45, %v348_v50 }
 0x36d   :  { %4303 = vmatmul.mubr.msk.f32.vlgmr.msra.gmra.mrb[0].mxu1 %vm313_vm3, %v356_v51 }
 0x36e   :  { %4317 = vmatprep.mubr.msk.f32.mxu1 %vm5027_vm4, %v5023_v6 }
 0x440   :  { %v4304_v53 = vpop.f32.mrb[0].mxu1 }
 0x441   :  { %v5319_v54 = vadd.f32 %v4304_v53, %v4085_v52  ;;  %v440_v55 = vpop.f32.mrb[1].mxu1 }
 0x442   :  { %v5321_v56 = vadd.f32 %v4085_v52, %v440_v55 }
 0x443   :  { %453 = vrot.lane.b32.xlu1 %v5319_v54, %s5024_s21 }
 0x444   :  { %459 = vrot.lane.b32.xlu0 %v5321_v56, %s5025_s28 }
 0x447   :  { %451 = vrot.lane.b32.xlu1 %v5321_v56, %s5024_s21 }
 0x44b   :  { %455 = vrot.lane.b32.xlu1 %v5321_v56, %s5026_s8 }
 0x44f   :  { %457 = vrot.lane.b32.xlu1 %v5319_v54, %s5026_s8 }
 0x453   :  { %461 = vrot.lane.b32.xlu1 %v5319_v54, %s5025_s28 }
 0x457   :  { %540 = vrot.lane.b32.xlu1 %v5319_v54, %s5028_s20 }
 0x45b   :  { %463 = vrot.lane.b32.xlu1 %v5321_v56, %s5028_s20 }
 0x4b5   :  { %v5343_v57 = vpop.permute.xlu1 %453 }
 0x4b6   :  { %v5355_v60 = vpop.permute.xlu0 %459 }
 0x4b9   :  { %v5345_v58 = vpop.permute.xlu1 %451 }
 0x4ba   :  { %616 = vrot.lane.b32.xlu1 %v5345_v58, %s5028_s20 }
 0x4bd   :  { %v5349_v59 = vpop.permute.xlu1 %455 }
 0x4be   :  { %692 = vrot.lane.b32.xlu1 %v5343_v57, %s5028_s20  ;;  %768 = vrot.lane.b32.xlu0 %v5349_v59, %s5028_s20 }
 0x4c1   :  { %v5357_v61 = vpop.permute.xlu1 %457 }
 0x4c2   :  { %920 = vrot.lane.b32.xlu0 %v5355_v60, %s5028_s20  ;;  %844 = vrot.lane.b32.xlu1 %v5357_v61, %s5028_s20 }
 0x4c5   :  { %v5363_v62 = vpop.permute.xlu1 %461 }
 0x4c6   :  { %996 = vrot.lane.b32.xlu1 %v5363_v62, %s5028_s20 }
 0x4c9   :  { %v541_v63 = vpop.permute.xlu1 %540 }
 0x4cd   :  { %v464_v0 = vpop.permute.xlu1 %463 }
 0x4ce   :  { %4306 = vmatpush3.xpose.msk.msra.mxu0 %vm465_vm5, %v464_v0 }
 0x4cf   :  { %4310 = vmatprep.subr.mxu0 %v5023_v6 }
 0x4d1   :  { %4308 = vmatmul.mubr.msk.f32.vlgmr.msra.gmra.mrb[2].mxu0 %vm465_vm5, %v5321_v56 }
 0x4d2   :  { %4311 = vmatpush3.xpose.msk.msra.mxu0 %vm465_vm5, %v541_v63  ;;  %4312 = vmatprep.mubr.msk.f32.mxu0 %vm5027_vm4, %v5023_v6 }
 0x4d3   :  { %4320 = vmatprep.subr.mxu0 %v5023_v6 }
 0x4d5   :  { %4313 = vmatmul.mubr.msk.f32.vlgmr.msra.gmra.mrb[4].mxu0 %vm465_vm5, %v5319_v54 }
 0x4d6   :  { %4322 = vmatprep.mubr.msk.f32.mxu0 %vm5027_vm4, %v5023_v6 }
 0x52c   :  { %v617_v1 = vpop.permute.xlu1 %616 }
 0x52d   :  { %4316 = vmatpush3.xpose.msk.msra.mxu1 %vm465_vm5, %v617_v1 }
 0x52e   :  { %4325 = vmatprep.subr.mxu1 %v5023_v6 }
 0x530   :  { %v769_v2 = vpop.permute.xlu0 %768  ;;  %4318 = vmatmul.mubr.msk.f32.vlgmr.msra.gmra.mrb[2].mxu1 %vm465_vm5, %v5345_v58  ;;  %v693_v3 = vpop.permute.xlu1 %692 }
 0x531   :  { %4321 = vmatpush3.xpose.msk.msra.mxu0 %vm465_vm5, %v693_v3  ;;  %4326 = vmatpush3.xpose.msk.msra.mxu1 %vm465_vm5, %v769_v2 }
 0x532   :  { %4327 = vmatprep.mubr.msk.f32.mxu1 %vm5027_vm4, %v5023_v6  ;;  %4330 = vmatprep.subr.mxu0 %v5023_v6 }
 0x533   :  { %4335 = vmatprep.subr.mxu1 %v5023_v6 }
 0x534   :  { %v921_v4 = vpop.permute.xlu0 %920  ;;  %4323 = vmatmul.mubr.msk.f32.vlgmr.msra.gmra.mrb[6].mxu0 %vm465_vm5, %v5343_v57  ;;  %4328 = vmatmul.mubr.msk.f32.vlgmr.msra.gmra.mrb[4].mxu1 %vm465_vm5, %v5349_v59  ;;  %v845_v5 = vpop.permute.xlu1 %844 }
 0x535   :  { %4331 = vmatpush3.xpose.msk.msra.mxu0 %vm465_vm5, %v845_v5  ;;  %4336 = vmatpush3.xpose.msk.msra.mxu1 %vm465_vm5, %v921_v4 }
 0x536   :  { %4332 = vmatprep.mubr.msk.f32.mxu0 %vm5027_vm4, %v5023_v6  ;;  %4337 = vmatprep.mubr.msk.f32.mxu1 %vm5027_vm4, %v5023_v6 }
 0x537   :  { %4340 = vmatprep.subr.mxu0 %v5023_v6  ;;  %4345 = vmatprep.subr.mxu1 %v5023_v6 }
 0x538   :  { %4333 = vmatmul.mubr.msk.f32.vlgmr.msra.gmra.mrb[8].mxu0 %vm465_vm5, %v5357_v61  ;;  %4338 = vmatmul.mubr.msk.f32.vlgmr.msra.gmra.mrb[6].mxu1 %vm465_vm5, %v5355_v60  ;;  %v997_v9 = vpop.permute.xlu1 %996 }
 0x539   :  { %4341 = vmatpush3.xpose.msk.msra.mxu0 %vm465_vm5, %v997_v9  ;;  %4342 = vmatprep.mubr.msk.f32.mxu0 %vm5027_vm4, %v5023_v6 }
 0x53a   :  { %4350 = vmatprep.subr.mxu0 %v5023_v6  ;;  %4347 = vmatprep.mubr.msk.f32.mxu1 %vm5027_vm4, %v5023_v6 }
 0x53c   :  { %4343 = vmatmul.mubr.msk.f32.vlgmr.msra.gmra.mrb[10].mxu0 %vm465_vm5, %v5363_v62 }
 0x53d   :  { %4352 = vmatprep.mubr.msk.f32.mxu0 %vm5027_vm4, %v5023_v6 }
 0x5a4   :  { %v536_v13 = vpop.f32.mrb[2].mxu0 }
 0x5a5   :  { %v1072_v14 = vmul.f32 0.35355338, %v536_v13  ;;  %v4309_v15 = vpop.f32.mrb[3].mxu0 }
 0x5a7   :  { %v1080_v18 = vadd.f32 %v1072_v14, %v5417_v12 }
 0x5a8   :  { %v612_v19 = vpop.f32.mrb[4].mxu0 }
 0x5a9   :  { %v1073_v20 = vmul.f32 0.35355338, %v612_v19  ;;  %v4314_v21 = vpop.f32.mrb[5].mxu0  ;;  %v1088_v22 = vsel %vm465_vm5, %v1080_v18, -inf }
 0x5aa   :  { %1089 = vmax.xlane.f32.xlu0 %v1088_v22 }
 0x5ab   :  { %v1081_v23 = vadd.f32 %v1073_v20, %v5417_v12 }
 0x5ad   :  { %v1091_v7 = vsel %vm465_vm5, %v1081_v23, -inf }
 0x5ae   :  { %1092 = vmax.xlane.f32.xlu1 %v1091_v7 }
 0x603   :  { %v688_v8 = vpop.f32.mrb[2].mxu1 }
 0x604   :  { %v1074_v24 = vmul.f32 0.35355338, %v688_v8  ;;  %v4319_v25 = vpop.f32.mrb[3].mxu1 }
 0x606   :  { %v1082_v26 = vadd.f32 %v1074_v24, %v5417_v12 }
 0x607   :  { %v764_v27 = vpop.f32.mrb[6].mxu0  ;;  %v840_v28 = vpop.f32.mrb[4].mxu1 }
 0x608   :  { %v1075_v29 = vmul.f32 0.35355338, %v764_v27  ;;  %v1076_v30 = vmul.f32 0.35355338, %v840_v28  ;;  %v4324_v31 = vpop.f32.mrb[7].mxu0  ;;  %v4329_v32 = vpop.f32.mrb[5].mxu1 }
 0x609   :  { %v1094_v33 = vsel %vm465_vm5, %v1082_v26, -inf }
 0x60a   :  { %1095 = vmax.xlane.f32.xlu0 %v1094_v33  ;;  %v1084_v34 = vadd.f32 %v1076_v30, %v5417_v12  ;;  %v1083_v35 = vadd.f32 %v1075_v29, %v5417_v12 }
 0x60b   :  { %v916_v36 = vpop.f32.mrb[8].mxu0  ;;  %v992_v37 = vpop.f32.mrb[6].mxu1 }
 0x60c   :  { %v1077_v38 = vmul.f32 0.35355338, %v916_v36  ;;  %v1078_v39 = vmul.f32 0.35355338, %v992_v37  ;;  %v4334_v40 = vpop.f32.mrb[9].mxu0  ;;  %v4339_v41 = vpop.f32.mrb[7].mxu1 }
 0x60d   :  { %v1100_v42 = vsel %vm465_vm5, %v1084_v34, -inf  ;;  %v1097_v43 = vsel %vm465_vm5, %v1083_v35, -inf }
 0x60e   :  { %1101 = vmax.xlane.f32.xlu1 %v1100_v42  ;;  %1098 = vmax.xlane.f32.xlu0 %v1097_v43  ;;  %v1086_v44 = vadd.f32 %v1078_v39, %v5417_v12  ;;  %v1085_v45 = vadd.f32 %v1077_v38, %v5417_v12 }
 0x60f   :  { %v1068_v46 = vpop.f32.mrb[10].mxu0 }
 0x610   :  { %v1079_v47 = vmul.f32 0.35355338, %v1068_v46  ;;  %v4344_v48 = vpop.f32.mrb[11].mxu0  ;;  %v1106_v49 = vsel %vm465_vm5, %v1086_v44, -inf  ;;  %v1103_v50 = vsel %vm465_vm5, %v1085_v45, -inf }
 0x612   :  { %1107 = vmax.xlane.f32.xlu1 %v1106_v49  ;;  %1104 = vmax.xlane.f32.xlu0 %v1103_v50  ;;  %v1087_v51 = vadd.f32 %v1079_v47, %v5417_v12 }
 0x614   :  { %v1109_v52 = vsel %vm465_vm5, %v1087_v51, -inf }
 0x616   :  { %1110 = vmax.xlane.f32.xlu0 %v1109_v52 }
 0x623   :  { %1176 = vrot.lane.b32.xlu1 %v5321_v56, %s5030_s11 }
 0x627   :  { %1328 = vrot.lane.b32.xlu1 %v5345_v58, %s5030_s11 }
 0x62b   :  { %1404 = vrot.lane.b32.xlu1 %v5343_v57, %s5030_s11 }
 0x62c   :  { %1252 = vrot.lane.b32.xlu0 %v5319_v54, %s5030_s11 }
 0x62f   :  { %1556 = vrot.lane.b32.xlu1 %v5357_v61, %s5030_s11 }
 0x630   :  { %1480 = vrot.lane.b32.xlu0 %v5349_v59, %s5030_s11 }
 0x637   :  { %v1090_v53 = vpop.xlane.xlu0 %1089 }
 0x638   :  { %v1112_v0 = vsub.f32 %v1080_v18, %v1090_v53 }
 0x63a   :  { %v1120_v1 = vmul.f32 1.442695, %v1112_v0 }
 0x63b   :  { %v1093_v55 = vpop.xlane.xlu1 %1092 }
 0x63c   :  { %v1113_v63 = vsub.f32 %v1081_v23, %v1093_v55 }
 0x63e   :  { %v1122_v56 = vmul.f32 1.442695, %v1113_v63 }
 0x640   :  { %4641 = vpow2.f32 %v1122_v56 }
 0x641   :  { %4643 = vpow2.f32 %v1120_v1 }
 0x64a   :  { %v5447_v58 = vpop.eup %4641 }
 0x64b   :  { %v1139_v57 = vsel %vm465_vm5, %v5447_v58, 0.0  ;;  %v5451_v54 = vpop.eup %4643 }
 0x64c   :  { %v1136_v61 = vsel %vm465_vm5, %v5451_v54, 0.0 }
 0x64f   :  { %1140 = vadd.xlane.f32.xlu0 %v1139_v57 }
 0x653   :  { %1137 = vadd.xlane.f32.xlu1 %v1136_v61 }
 0x697   :  { %v1096_v59 = vpop.xlane.xlu0 %1095 }
 0x698   :  { %v1114_v2 = vsub.f32 %v1082_v26, %v1096_v59 }
 0x69a   :  { %v1124_v3 = vmul.f32 1.442695, %v1114_v2 }
 0x69b   :  { %v1099_v4 = vpop.xlane.xlu0 %1098  ;;  %v1102_v5 = vpop.xlane.xlu1 %1101 }
 0x69c   :  { %4645 = vpow2.f32 %v1124_v3  ;;  %v1115_v9 = vsub.f32 %v1083_v35, %v1099_v4  ;;  %v1116_v10 = vsub.f32 %v1084_v34, %v1102_v5 }
 0x69e   :  { %v1126_v11 = vmul.f32 1.442695, %v1115_v9  ;;  %v1128_v13 = vmul.f32 1.442695, %v1116_v10  ;;  %v1815_v10 = vld [vmem:[#allocation11] sm:$0xff] }
 0x69f   :  { %v1105_v14 = vpop.xlane.xlu0 %1104  ;;  %v1108_v15 = vpop.xlane.xlu1 %1107 }
 0x6a0   :  { %4647 = vpow2.f32 %v1126_v11  ;;  %v1117_v18 = vsub.f32 %v1085_v45, %v1105_v14  ;;  %v1118_v19 = vsub.f32 %v1086_v44, %v1108_v15  ;;  %v1816_v11 = vld [vmem:[#allocation11 + $0x8] sm:$0xff]  ;;  %v1817_v14 = vld [vmem:[#allocation11 + $0x10] sm:$0xff]  ;;  %v1818_v15 = vld [vmem:[#allocation11 + $0x18] sm:$0xff] }
 0x6a1   :  { %4649 = vpow2.f32 %v1128_v13  ;;  %v4554_v13 = vpack.c.bf16 %v1816_v11, %v1815_v10  ;;  %v4115_v10 = vld [vmem:[#allocation14] ss:$0 sm:$0xff] }
 0x6a2   :  { %v1130_v20 = vmul.f32 1.442695, %v1117_v18  ;;  %v1132_v21 = vmul.f32 1.442695, %v1118_v19  ;;  %v4558_v18 = vpack.c.bf16 %v1818_v15, %v1817_v14 }
 0x6a3   :  { %v1111_v22 = vpop.xlane.xlu0 %1110  ;;  %v1177_v23 = vpop.permute.xlu1 %1176 }
 0x6a4   :  { %4651 = vpow2.f32 %v1130_v20  ;;  %v1119_v7 = vsub.f32 %v1087_v51, %v1111_v22  ;;  %4346 = vmatpush3.msra.mxu1 %v1177_v23 }
 0x6a5   :  { %4653 = vpow2.f32 %v1132_v21  ;;  %4355 = vmatprep.subr.mxu1 %v5023_v6 }
 0x6a6   :  { %v4646_v8 = vpop.eup %4645  ;;  %v1134_v24 = vmul.f32 1.442695, %v1119_v7 }
 0x6a7   :  { %v1253_v25 = vpop.permute.xlu0 %1252  ;;  %v1142_v26 = vsel %vm465_vm5, %v4646_v8, 0.0  ;;  %v1329_v37 = vpop.permute.xlu1 %1328 }
 0x6a8   :  { %4655 = vpow2.f32 %v1134_v24  ;;  %1143 = vadd.xlane.f32.xlu1 %v1142_v26  ;;  %4351 = vmatpush3.msra.mxu0 %v1253_v25 }
 0x6a9   :  { %4360 = vmatprep.subr.mxu0 %v5023_v6 }
 0x6aa   :  { %v4648_v27 = vpop.eup %4647 }
 0x6ab   :  { %v4650_v28 = vpop.eup %4649  ;;  %v1145_v29 = vsel %vm465_vm5, %v4648_v27, 0.0  ;;  %v1405_v38 = vpop.permute.xlu1 %1404 }
 0x6ac   :  { %1146 = vadd.xlane.f32.xlu0 %v1145_v29  ;;  %v1148_v30 = vsel %vm465_vm5, %v4650_v28, 0.0  ;;  %v1481_v39 = vpop.permute.xlu0 %1480 }
 0x6ad   :  { %1149 = vadd.xlane.f32.xlu1 %v1148_v30 }
 0x6ae   :  { %v4652_v31 = vpop.eup %4651 }
 0x6af   :  { %v4654_v32 = vpop.eup %4653  ;;  %v1151_v33 = vsel %vm465_vm5, %v4652_v31, 0.0  ;;  %v1557_v40 = vpop.permute.xlu1 %1556 }
 0x6b0   :  { %1152 = vadd.xlane.f32.xlu0 %v1151_v33  ;;  %v1154_v34 = vsel %vm465_vm5, %v4654_v32, 0.0 }
 0x6b1   :  { %1155 = vadd.xlane.f32.xlu1 %v1154_v34 }
 0x6b2   :  { %v5462_v35 = vpop.eup %4655 }
 0x6b3   :  { %v1157_v36 = vsel %vm465_vm5, %v5462_v35, 0.0 }
 0x6b4   :  { %1158 = vadd.xlane.f32.xlu0 %v1157_v36 }
 0x6c2   :  { %1708 = vrot.lane.b32.xlu1 %v5363_v62, %s5030_s11 }
 0x6ca   :  { %1632 = vrot.lane.b32.xlu0 %v5355_v60, %s5030_s11 }
 0x6dc   :  { %v1141_v41 = vpop.xlane.xlu0 %1140 }
 0x6dd   :  { %4657 = vrcp.f32 %v1141_v41  ;;  %v4112_v41 = vld [vmem:[#allocation13] ss:$0 sm:$0xff] }
 0x6e0   :  { %v1138_v42 = vpop.xlane.xlu1 %1137 }
 0x6e1   :  { %4659 = vrcp.f32 %v1138_v42 }
 0x6e7   :  { %v4658_v43 = vpop.eup %4657 }
 0x6e8   :  { %v1169_v44 = vmul.f32 %v4658_v43, %v5447_v58 }
 0x6ea   :  { %4353 = vmatmul.mubr.msk.f32.vlgmr.msra.gmra.mrb[12].mxu0 %vm465_vm5, %v1169_v44 }
 0x6eb   :  { %v4660_v45 = vpop.eup %4659  ;;  %4361 = vmatpush3.msra.mxu0 %v1405_v38  ;;  %4362 = vmatprep.mubr.msk.f32.mxu0 %vm5027_vm4, %v5023_v6 }
 0x6ec   :  { %v1168_v60 = vmul.f32 %v4660_v45, %v5451_v54  ;;  %4370 = vmatprep.subr.mxu0 %v5023_v6 }
 0x6ee   :  { %4348 = vmatmul.mubr.msk.f32.vlgmr.msra.gmra.mrb[8].mxu1 %vm465_vm5, %v1168_v60 }
 0x6ef   :  { %4356 = vmatpush3.msra.mxu1 %v1329_v37  ;;  %4357 = vmatprep.mubr.msk.f32.mxu1 %vm5027_vm4, %v5023_v6 }
 0x6f0   :  { %4365 = vmatprep.subr.mxu1 %v5023_v6 }
 0x735   :  { %v1144_v62 = vpop.xlane.xlu1 %1143 }
 0x736   :  { %4661 = vrcp.f32 %v1144_v62 }
 0x739   :  { %v1147_v46 = vpop.xlane.xlu0 %1146 }
 0x73a   :  { %4663 = vrcp.f32 %v1147_v46  ;;  %v1150_v47 = vpop.xlane.xlu1 %1149 }
 0x73b   :  { %4665 = vrcp.f32 %v1150_v47 }
 0x73d   :  { %v1153_v48 = vpop.xlane.xlu0 %1152 }
 0x73e   :  { %4667 = vrcp.f32 %v1153_v48  ;;  %v1156_v49 = vpop.xlane.xlu1 %1155 }
 0x73f   :  { %4669 = vrcp.f32 %v1156_v49 }
 0x740   :  { %v4662_v50 = vpop.eup %4661 }
 0x741   :  { %v1170_v51 = vmul.f32 %v4662_v50, %v4646_v8  ;;  %v1159_v52 = vpop.xlane.xlu0 %1158 }
 0x742   :  { %4671 = vrcp.f32 %v1159_v52  ;;  %v1709_v61 = vpop.permute.xlu1 %1708 }
 0x743   :  { %4358 = vmatmul.mubr.msk.f32.vlgmr.msra.gmra.mrb[10].mxu1 %vm465_vm5, %v1170_v51 }
 0x744   :  { %v4664_v53 = vpop.eup %4663  ;;  %4366 = vmatpush3.msra.mxu1 %v1481_v39  ;;  %4367 = vmatprep.mubr.msk.f32.mxu1 %vm5027_vm4, %v5023_v6 }
 0x745   :  { %v4666_v55 = vpop.eup %4665  ;;  %v1171_v63 = vmul.f32 %v4664_v53, %v4648_v27  ;;  %4375 = vmatprep.subr.mxu1 %v5023_v6  ;;  %v1633_v56 = vpop.permute.xlu0 %1632 }
 0x746   :  { %v1172_v0 = vmul.f32 %v4666_v55, %v4650_v28 }
 0x747   :  { %4363 = vmatmul.mubr.msk.f32.vlgmr.msra.gmra.mrb[14].mxu0 %vm465_vm5, %v1171_v63 }
 0x748   :  { %v4668_v1 = vpop.eup %4667  ;;  %4368 = vmatmul.mubr.msk.f32.vlgmr.msra.gmra.mrb[12].mxu1 %vm465_vm5, %v1172_v0  ;;  %4371 = vmatpush3.msra.mxu0 %v1557_v40  ;;  %v1953_v0 = vld [vmem:[#allocation17] sm:$0xff] }
 0x749   :  { %v4670_v58 = vpop.eup %4669  ;;  %v1173_v57 = vmul.f32 %v4668_v1, %v4652_v31  ;;  %4376 = vmatpush3.msra.mxu1 %v1633_v56  ;;  %4372 = vmatprep.mubr.msk.f32.mxu0 %vm5027_vm4, %v5023_v6  ;;  %v1954_v56 = vld [vmem:[#allocation17 + $0x8] sm:$0xff] }
 0x74a   :  { %v1174_v54 = vmul.f32 %v4670_v58, %v4654_v32  ;;  %4377 = vmatprep.mubr.msk.f32.mxu1 %vm5027_vm4, %v5023_v6  ;;  %4380 = vmatprep.subr.mxu0 %v5023_v6  ;;  %v4562_v1 = vpack.c.bf16 %v1954_v56, %v1953_v0  ;;  %v1955_v58 = vld [vmem:[#allocation17 + $0x10] sm:$0xff] }
 0x74b   :  { %4373 = vmatmul.mubr.msk.f32.vlgmr.msra.gmra.mrb[16].mxu0 %vm465_vm5, %v1173_v57  ;;  %4555 = vmatprep.subr.bf16.mxu1 %v4554_v13  ;;  %v1956_v57 = vld [vmem:[#allocation17 + $0x18] sm:$0xff] }
 0x74c   :  { %v4672_v59 = vpop.eup %4671  ;;  %4378 = vmatmul.mubr.msk.f32.vlgmr.msra.gmra.mrb[14].mxu1 %vm465_vm5, %v1174_v54  ;;  %4381 = vmatpush3.msra.mxu0 %v1709_v61  ;;  %v4566_v54 = vpack.c.bf16 %v1956_v57, %v1955_v58 }
 0x74d   :  { %v1175_v2 = vmul.f32 %v4672_v59, %v5462_v35  ;;  %4382 = vmatprep.mubr.msk.f32.mxu0 %vm5027_vm4, %v5023_v6  ;;  %4557 = vmatpush3.bf16.msra.mxu1 %v4554_v13  ;;  %v4116_v13 = vld [vmem:[#allocation16] ss:$0 sm:$0xff] }
 0x74e   :  { %4559 = vmatprep.subr.bf16.mxu1 %v4558_v18  ;;  %4563 = vmatprep.subr.bf16.mxu0 %v4562_v1 }
 0x74f   :  { %4383 = vmatmul.mubr.msk.f32.vlgmr.msra.gmra.mrb[18].mxu0 %vm465_vm5, %v1175_v2 }
 0x750   :  { %4565 = vmatpush3.bf16.msra.mxu0 %v4562_v1 }
 0x751   :  { %4561 = vmatpush3.bf16.msra.mxu1 %v4558_v18  ;;  %4567 = vmatprep.subr.bf16.mxu0 %v4566_v54 }
 0x754   :  { %4569 = vmatpush3.bf16.msra.mxu0 %v4566_v54 }
 0x7bd   :  { %v1324_v3 = vpop.f32.mrb[12].mxu0 }
 0x7be   :  { %v4354_v4 = vpop.f32.mrb[13].mxu0 }
 0x7c1   :  { %v1248_v5 = vpop.f32.mrb[8].mxu1 }
 0x7c2   :  { %v4349_v9 = vpop.f32.mrb[9].mxu1 }
 0x816   :  { %v1400_v19 = vpop.f32.mrb[10].mxu1 }
 0x817   :  { %1786 = vrot.lane.b32.xlu0 %v1400_v19, %s5011_s19  ;;  %v4359_v20 = vpop.f32.mrb[11].mxu1 }
 0x81a   :  { %v1476_v21 = vpop.f32.mrb[14].mxu0 }
 0x81b   :  { %v1552_v22 = vpop.f32.mrb[12].mxu1  ;;  %1788 = vrot.lane.b32.xlu1 %v1476_v21, %s5011_s19  ;;  %v4364_v23 = vpop.f32.mrb[15].mxu0 }
 0x81c   :  { %1794 = vrot.lane.b32.xlu0 %v1552_v22, %s5014_s24  ;;  %v4369_v7 = vpop.f32.mrb[13].mxu1  ;;  %v2063_v22 = vld [vmem:[%s5828_s13] sm:$0xff]  ;;  %v2064_v23 = vld [vmem:[%s5828_s13 + $0x8] sm:$0xff] }
 0x81d   :  { %v2065_v7 = vld [vmem:[%s5828_s13 + $0x10] sm:$0xff] }
 0x81e   :  { %v1628_v8 = vpop.f32.mrb[16].mxu0 }
 0x81f   :  { %v1704_v24 = vpop.f32.mrb[14].mxu1  ;;  %1796 = vrot.lane.b32.xlu1 %v1628_v8, %s5014_s24  ;;  %v4374_v25 = vpop.f32.mrb[17].mxu0  ;;  %v4570_v8 = vpack.c.bf16 %v2064_v23, %v2063_v22 }
 0x820   :  { %1802 = vrot.lane.b32.xlu0 %v1704_v24, %s5031_s9  ;;  %v4379_v26 = vpop.f32.mrb[15].mxu1  ;;  %v2066_v24 = vld [vmem:[%s5828_s13 + $0x18] sm:$0xff] }
 0x821   :  { %v4574_v25 = vpack.c.bf16 %v2066_v24, %v2065_v7  ;;  %4571 = vmatprep.subr.bf16.mxu1 %v4570_v8  ;;  %v4117_v26 = vld [vmem:[#allocation19] ss:$0 sm:$0xff] }
 0x822   :  { %v1780_v27 = vpop.f32.mrb[18].mxu0 }
 0x823   :  { %1804 = vrot.lane.b32.xlu1 %v1780_v27, %s5031_s9  ;;  %v4384_v28 = vpop.f32.mrb[19].mxu0 }
 0x889   :  { %v1787_v29 = vpop.permute.xlu0 %1786 }
 0x88a   :  { %v1808_v32 = vsel %vm465_vm5, %v1248_v5, %v1787_v29 }
 0x88d   :  { %v1789_v30 = vpop.permute.xlu1 %1788 }
 0x88e   :  { %v1795_v31 = vpop.permute.xlu0 %1794  ;;  %v1809_v37 = vsel %vm465_vm5, %v1324_v3, %v1789_v30 }
 0x88f   :  { %v1810_v34 = vsel %vm222_vm0, %v1808_v32, %v1795_v31 }
 0x891   :  { %v1797_v33 = vpop.permute.xlu1 %1796 }
 0x892   :  { %v1803_v35 = vpop.permute.xlu0 %1802  ;;  %v1811_v38 = vsel %vm222_vm0, %v1809_v37, %v1797_v33 }
 0x893   :  { %v1813_v36 = vsel %vm1812_vm7, %v1810_v34, %v1803_v35 }
 0x894   :  { %4393 = vmatprep.mubr.msk.f32.mxu1 %vm313_vm3, %v1813_v36 }
 0x895   :  { %v1805_v39 = vpop.permute.xlu1 %1804 }
 0x896   :  { %v1814_v40 = vsel %vm1812_vm7, %v1811_v38, %v1805_v39 }
 0x897   :  { %4394 = vmatmul.mubr.msk.f32.vlgmr.msra.gmra.mrb[16].mxu1 %vm313_vm3, %v1814_v40 }
 0x898   :  { %4573 = vmatpush3.bf16.msra.mxu1 %v4570_v8  ;;  %v4125_v8 = vld [vmem:[#allocation7 + $0x1] ss:$0 sm:$0xff] }
 0x899   :  { %4575 = vmatprep.subr.bf16.mxu1 %v4574_v25 }
 0x89c   :  { %4577 = vmatpush3.bf16.msra.mxu1 %v4574_v25 }
 0x89d   :  { %4429 = vmatprep.subr.mxu1 %v5023_v6 }
 0x96a   :  { %v4395_v42 = vpop.f32.mrb[16].mxu1 }
 0x96b   :  { %v1904_v43 = vadd.f32 %v4395_v42, %v4112_v41  ;;  %v1898_v44 = vpop.f32.mrb[17].mxu1 }
 0x96c   :  { %v1899_v45 = vadd.f32 %v4112_v41, %v1898_v44 }
 0x96d   :  { %v5512_v60 = vadd.f32 %v1904_v43, %v5303_v17 }
 0x96e   :  { %v5515_v62 = vadd.f32 %v1899_v45, %v5301_v16 }
 0x96f   :  { %v1914_v46 = vsel %vm313_vm3, %v5512_v60, 0.0 }
 0x970   :  { %1915 = vadd.xlane.f32.xlu1 %v1914_v46  ;;  %v1911_v47 = vsel %vm313_vm3, %v5515_v62, 0.0 }
 0x971   :  { %1912 = vadd.xlane.f32.xlu0 %v1911_v47 }
 0x9fd   :  { %v1916_v48 = vpop.xlane.xlu1 %1915 }
 0x9fe   :  { %v1918_v49 = vmul.f32 0.03125, %v1916_v48  ;;  %v1913_v50 = vpop.xlane.xlu0 %1912 }
 0x9ff   :  { %v1917_v51 = vmul.f32 0.03125, %v1913_v50 }
 0xa00   :  { %v1920_v52 = vsub.f32 %v5512_v60, %v1918_v49  ;;  %v4120_v49 = vld [vmem:[%s5829_s14] ss:$0 sm:$0xff] }
 0xa01   :  { %v1919_v17 = vsub.f32 %v5515_v62, %v1917_v51 }
 0xa02   :  { %v1922_v55 = vmul.f32 %v1920_v52, %v1920_v52 }
 0xa03   :  { %v1921_v53 = vmul.f32 %v1919_v17, %v1919_v17 }
 0xa04   :  { %v1926_v63 = vsel %vm313_vm3, %v1922_v55, 0.0 }
 0xa05   :  { %v1923_v16 = vsel %vm313_vm3, %v1921_v53, 0.0 }
 0xa06   :  { %1924 = vadd.xlane.f32.xlu0 %v1923_v16 }
 0xa0a   :  { %1927 = vadd.xlane.f32.xlu0 %v1926_v63 }
 0xa93   :  { %v1925_v61 = vpop.xlane.xlu0 %1924 }
 0xa94   :  { %v1929_v59 = vmul.f32 0.03125, %v1925_v61 }
 0xa96   :  { %v1931_v2 = vadd.f32 1e-05, %v1929_v59 }
 0xa97   :  { %v1928_v3 = vpop.xlane.xlu0 %1927 }
 0xa98   :  { %4673 = vrsqrt.f32 %v1931_v2  ;;  %v1930_v4 = vmul.f32 0.03125, %v1928_v3  ;;  %v2204_v2 = vld [vmem:[#allocation8 + $0x20] sm:$0xff]  ;;  %v2205_v3 = vld [vmem:[#allocation8 + $0x28] sm:$0xff] }
 0xa9a   :  { %v1932_v5 = vadd.f32 1e-05, %v1930_v4  ;;  %v4578_v4 = vpack.c.bf16 %v2205_v3, %v2204_v2 }
 0xa9c   :  { %4675 = vrsqrt.f32 %v1932_v5  ;;  %v2206_v5 = vld [vmem:[#allocation8 + $0x30] sm:$0xff]  ;;  %4579 = vmatprep.subr.bf16.mxu0 %v4578_v4 }
 0xaa2   :  { %v4674_v9 = vpop.eup %4673 }
 0xaa3   :  { %v1935_v11 = vmul.f32 %v4674_v9, %v1919_v17  ;;  %v2207_v9 = vld [vmem:[#allocation8 + $0x38] sm:$0xff] }
 0xaa5   :  { %v1943_v14 = vmul.f32 %v4115_v10, %v1935_v11 }
 0xaa6   :  { %v4676_v15 = vpop.eup %4675 }
 0xaa7   :  { %v1936_v18 = vmul.f32 %v4676_v15, %v1920_v52  ;;  %v1951_v19 = vadd.f32 %v4116_v13, %v1943_v14 }
 0xaa9   :  { %v1944_v20 = vmul.f32 %v4115_v10, %v1936_v18  ;;  %4404 = vmatprep.mubr.msk.f32.mxu0 %vm313_vm3, %v1951_v19  ;;  %v4582_v10 = vpack.c.bf16 %v2207_v9, %v2206_v5 }
 0xaab   :  { %v1952_v21 = vadd.f32 %v4116_v13, %v1944_v20 }
 0xaad   :  { %4405 = vmatmul.mubr.msk.f32.vlgmr.msra.gmra.mrb[20].mxu0 %vm313_vm3, %v1952_v21  ;;  %v4124_v21 = vld [vmem:[%s5818_s3 + $0x1] ss:$0 sm:$0xff] }
 0xaae   :  { %4581 = vmatpush3.bf16.msra.mxu0 %v4578_v4 }
 0xaaf   :  { %4583 = vmatprep.subr.bf16.mxu0 %v4582_v10 }
 0xab2   :  { %4585 = vmatpush3.bf16.msra.mxu0 %v4582_v10 }
 0xab3   :  { %4434 = vmatprep.subr.mxu0 %v5023_v6 }
 0xb80   :  { %v4406_v27 = vpop.f32.mrb[20].mxu0 }
 0xb81   :  { %v2042_v28 = vadd.f32 %v4406_v27, %v4117_v26  ;;  %v2036_v29 = vpop.f32.mrb[21].mxu0 }
 0xb82   :  { %v2037_v30 = vadd.f32 %v4117_v26, %v2036_v29 }
 0xb83   :  { %v2048_v31 = vmul.f32 0.044715, %v2042_v28  ;;  %v2046_v46 = vmul.f32 0.5, %v2042_v28 }
 0xb84   :  { %v2047_v32 = vmul.f32 0.044715, %v2037_v30  ;;  %v2045_v44 = vmul.f32 0.5, %v2037_v30 }
 0xb85   :  { %v2050_v33 = vmul.f32 %v2048_v31, %v2042_v28 }
 0xb86   :  { %v2049_v34 = vmul.f32 %v2047_v32, %v2037_v30 }
 0xb87   :  { %v2052_v35 = vmul.f32 %v2050_v33, %v2042_v28 }
 0xb88   :  { %v2051_v36 = vmul.f32 %v2049_v34, %v2037_v30 }
 0xb89   :  { %v2054_v37 = vadd.f32 %v2052_v35, %v2042_v28  ;;  %v4126_v28 = vld [vmem:[#allocation10 + $0x1] ss:$0 sm:$0xff] }
 0xb8a   :  { %v2053_v38 = vadd.f32 %v2051_v36, %v2037_v30 }
 0xb8b   :  { %v2056_v39 = vmul.f32 0.7978845, %v2054_v37 }
 0xb8c   :  { %v2055_v40 = vmul.f32 0.7978845, %v2053_v38 }
 0xb8d   :  { %4677 = vtanh.f32 %v2056_v39 }
 0xb8e   :  { %4679 = vtanh.f32 %v2055_v40 }
 0xb97   :  { %v4678_v41 = vpop.eup %4677 }
 0xb98   :  { %v4680_v42 = vpop.eup %4679  ;;  %v2060_v43 = vadd.f32 1.0, %v4678_v41 }
 0xb99   :  { %v2059_v45 = vadd.f32 1.0, %v4680_v42 }
 0xb9a   :  { %v2062_v48 = vmul.f32 %v2060_v43, %v2046_v46 }
 0xb9b   :  { %v2061_v47 = vmul.f32 %v2059_v45, %v2045_v44 }
 0xb9d   :  { %4415 = vmatprep.mubr.msk.f32.mxu1 %vm313_vm3, %v2061_v47 }
 0xb9e   :  { %4416 = vmatmul.mubr.msk.f32.vlgmr.msra.gmra.mrb[18].mxu1 %vm313_vm3, %v2062_v48 }
 0xb9f   :  { %4431 = vmatprep.mubr.msk.f32.mxu1 %vm5027_vm4, %v5023_v6 }
 0xc71   :  { %v4417_v50 = vpop.f32.mrb[18].mxu1 }
 0xc72   :  { %v2152_v51 = vadd.f32 %v4417_v50, %v4120_v49  ;;  %v2146_v52 = vpop.f32.mrb[19].mxu1 }
 0xc73   :  { %v2147_v17 = vadd.f32 %v4120_v49, %v2146_v52 }
 0xc74   :  { %v5548_v53 = vadd.f32 %v2152_v51, %v5512_v60 }
 0xc75   :  { %v5551_v16 = vadd.f32 %v2147_v17, %v5515_v62 }
 0xc76   :  { %v2164_v55 = vsel %vm313_vm3, %v5548_v53, 0.0 }
 0xc77   :  { %2165 = vadd.xlane.f32.xlu0 %v2164_v55  ;;  %v2161_v63 = vsel %vm313_vm3, %v5551_v16, 0.0 }
 0xc78   :  { %2162 = vadd.xlane.f32.xlu1 %v2161_v63 }
 0xd04   :  { %v2166_v0 = vpop.xlane.xlu0 %2165 }
 0xd05   :  { %v2168_v56 = vmul.f32 0.03125, %v2166_v0  ;;  %v2163_v1 = vpop.xlane.xlu1 %2162 }
 0xd06   :  { %v2167_v58 = vmul.f32 0.03125, %v2163_v1 }
 0xd07   :  { %v2170_v57 = vsub.f32 %v5548_v53, %v2168_v56 }
 0xd08   :  { %v2169_v60 = vsub.f32 %v5551_v16, %v2167_v58 }
 0xd09   :  { %v2172_v54 = vmul.f32 %v2170_v57, %v2170_v57 }
 0xd0a   :  { %v2171_v61 = vmul.f32 %v2169_v60, %v2169_v60 }
 0xd0b   :  { %v2176_v62 = vsel %vm313_vm3, %v2172_v54, 0.0 }
 0xd0c   :  { %2177 = vadd.xlane.f32.xlu0 %v2176_v62  ;;  %v2173_v59 = vsel %vm313_vm3, %v2171_v61, 0.0 }
 0xd0d   :  { %2174 = vadd.xlane.f32.xlu1 %v2173_v59 }
 0xd99   :  { %v2178_v11 = vpop.xlane.xlu0 %2177 }
 0xd9a   :  { %v2180_v13 = vmul.f32 0.03125, %v2178_v11  ;;  %v2175_v14 = vpop.xlane.xlu1 %2174 }
 0xd9b   :  { %v2179_v15 = vmul.f32 0.03125, %v2175_v14 }
 0xd9c   :  { %v2182_v18 = vadd.f32 1e-05, %v2180_v13 }
 0xd9d   :  { %v2181_v19 = vadd.f32 1e-05, %v2179_v15 }
 0xd9e   :  { %4681 = vrsqrt.f32 %v2182_v18 }
 0xd9f   :  { %4683 = vrsqrt.f32 %v2181_v19 }
 0xda8   :  { %v4682_v20 = vpop.eup %4681 }
 0xda9   :  { %v4684_v22 = vpop.eup %4683  ;;  %v2186_v23 = vmul.f32 %v4682_v20, %v2170_v57 }
 0xdaa   :  { %v2185_v7 = vmul.f32 %v4684_v22, %v2169_v60 }
 0xdab   :  { %v2194_v24 = vmul.f32 %v4124_v21, %v2186_v23 }
 0xdac   :  { %v2193_v25 = vmul.f32 %v4124_v21, %v2185_v7 }
 0xdad   :  { %v2202_v27 = vadd.f32 %v4125_v8, %v2194_v24 }
 0xdae   :  { %v2201_v26 = vadd.f32 %v4125_v8, %v2193_v25 }
 0xdb0   :  { %4426 = vmatprep.mubr.msk.f32.mxu0 %vm313_vm3, %v2201_v26 }
 0xdb1   :  { %4427 = vmatmul.mubr.msk.f32.vlgmr.msra.gmra.mrb[22].mxu0 %vm313_vm3, %v2202_v27 }
 0xdb2   :  { %4436 = vmatprep.mubr.msk.f32.mxu0 %vm5027_vm4, %v5023_v6 }
 0xe84   :  { %v4428_v29 = vpop.f32.mrb[22].mxu0 }
 0xe85   :  { %v5569_v30 = vadd.f32 %v4428_v29, %v4126_v28  ;;  %v2288_v31 = vpop.f32.mrb[23].mxu0 }
 0xe86   :  { %v5571_v32 = vadd.f32 %v4126_v28, %v2288_v31 }
 0xe87   :  { %2301 = vrot.lane.b32.xlu0 %v5569_v30, %s5024_s21 }
 0xe88   :  { %2299 = vrot.lane.b32.xlu1 %v5571_v32, %s5024_s21 }
 0xe8b   :  { %2307 = vrot.lane.b32.xlu0 %v5571_v32, %s5025_s28 }
 0xe8c   :  { %2303 = vrot.lane.b32.xlu1 %v5571_v32, %s5026_s8 }
 0xe8f   :  { %2311 = vrot.lane.b32.xlu0 %v5571_v32, %s5028_s20 }
 0xe90   :  { %2305 = vrot.lane.b32.xlu1 %v5569_v30, %s5026_s8 }
 0xe94   :  { %2309 = vrot.lane.b32.xlu1 %v5569_v30, %s5025_s28 }
 0xe98   :  { %2387 = vrot.lane.b32.xlu1 %v5569_v30, %s5028_s20 }
 0xef9   :  { %v5589_v33 = vpop.permute.xlu0 %2301 }
 0xefa   :  { %2539 = vrot.lane.b32.xlu1 %v5589_v33, %s5028_s20  ;;  %v5593_v34 = vpop.permute.xlu1 %2299 }
 0xefb   :  { %2463 = vrot.lane.b32.xlu0 %v5593_v34, %s5028_s20 }
 0xefd   :  { %v5597_v35 = vpop.permute.xlu0 %2307 }
 0xefe   :  { %v5599_v36 = vpop.permute.xlu1 %2303 }
 0xeff   :  { %2615 = vrot.lane.b32.xlu0 %v5599_v36, %s5028_s20 }
 0xf01   :  { %v2312_v37 = vpop.permute.xlu0 %2311 }
 0xf02   :  { %4430 = vmatpush3.xpose.msk.msra.mxu1 %vm465_vm5, %v2312_v37  ;;  %v5604_v38 = vpop.permute.xlu1 %2305 }
 0xf03   :  { %2767 = vrot.lane.b32.xlu0 %v5597_v35, %s5028_s20  ;;  %2691 = vrot.lane.b32.xlu1 %v5604_v38, %s5028_s20 }
 0xf04   :  { %4439 = vmatprep.subr.mxu1 %v5023_v6 }
 0xf05   :  { %4432 = vmatmul.mubr.msk.f32.vlgmr.msra.gmra.mrb[20].mxu1 %vm465_vm5, %v5571_v32 }
 0xf06   :  { %v5613_v39 = vpop.permute.xlu1 %2309  ;;  %4441 = vmatprep.mubr.msk.f32.mxu1 %vm5027_vm4, %v5023_v6 }
 0xf07   :  { %2843 = vrot.lane.b32.xlu1 %v5613_v39, %s5028_s20 }
 0xf0a   :  { %v2388_v40 = vpop.permute.xlu1 %2387 }
 0xf0b   :  { %4435 = vmatpush3.xpose.msk.msra.mxu0 %vm465_vm5, %v2388_v40 }
 0xf0c   :  { %4444 = vmatprep.subr.mxu0 %v5023_v6 }
 0xf0e   :  { %4437 = vmatmul.mubr.msk.f32.vlgmr.msra.gmra.mrb[24].mxu0 %vm465_vm5, %v5569_v30 }
 0xf0f   :  { %4446 = vmatprep.mubr.msk.f32.mxu0 %vm5027_vm4, %v5023_v6 }
 0xf6c   :  { %v2540_v41 = vpop.permute.xlu1 %2539 }
 0xf6d   :  { %v2464_v42 = vpop.permute.xlu0 %2463  ;;  %4445 = vmatpush3.xpose.msk.msra.mxu0 %vm465_vm5, %v2540_v41 }
 0xf6e   :  { %4440 = vmatpush3.xpose.msk.msra.mxu1 %vm465_vm5, %v2464_v42  ;;  %4454 = vmatprep.subr.mxu0 %v5023_v6 }
 0xf6f   :  { %4449 = vmatprep.subr.mxu1 %v5023_v6 }
 0xf70   :  { %4447 = vmatmul.mubr.msk.f32.vlgmr.msra.gmra.mrb[26].mxu0 %vm465_vm5, %v5589_v33 }
 0xf71   :  { %4442 = vmatmul.mubr.msk.f32.vlgmr.msra.gmra.mrb[22].mxu1 %vm465_vm5, %v5593_v34  ;;  %v2616_v43 = vpop.permute.xlu0 %2615  ;;  %4456 = vmatprep.mubr.msk.f32.mxu0 %vm5027_vm4, %v5023_v6 }
 0xf72   :  { %4450 = vmatpush3.xpose.msk.msra.mxu1 %vm465_vm5, %v2616_v43  ;;  %4451 = vmatprep.mubr.msk.f32.mxu1 %vm5027_vm4, %v5023_v6 }
 0xf73   :  { %4459 = vmatprep.subr.mxu1 %v5023_v6 }
 0xf75   :  { %4452 = vmatmul.mubr.msk.f32.vlgmr.msra.gmra.mrb[24].mxu1 %vm465_vm5, %v5599_v36  ;;  %v2768_v44 = vpop.permute.xlu0 %2767  ;;  %v2692_v45 = vpop.permute.xlu1 %2691 }
 0xf76   :  { %4455 = vmatpush3.xpose.msk.msra.mxu0 %vm465_vm5, %v2692_v45  ;;  %4460 = vmatpush3.xpose.msk.msra.mxu1 %vm465_vm5, %v2768_v44 }
 0xf77   :  { %4461 = vmatprep.mubr.msk.f32.mxu1 %vm5027_vm4, %v5023_v6  ;;  %4464 = vmatprep.subr.mxu0 %v5023_v6 }
 0xf78   :  { %4469 = vmatprep.subr.mxu1 %v5023_v6 }
 0xf79   :  { %4457 = vmatmul.mubr.msk.f32.vlgmr.msra.gmra.mrb[28].mxu0 %vm465_vm5, %v5604_v38  ;;  %4462 = vmatmul.mubr.msk.f32.vlgmr.msra.gmra.mrb[26].mxu1 %vm465_vm5, %v5597_v35  ;;  %v2844_v46 = vpop.permute.xlu1 %2843 }
 0xf7a   :  { %4465 = vmatpush3.xpose.msk.msra.mxu0 %vm465_vm5, %v2844_v46  ;;  %4466 = vmatprep.mubr.msk.f32.mxu0 %vm5027_vm4, %v5023_v6 }
 0xf7b   :  { %4474 = vmatprep.subr.mxu0 %v5023_v6  ;;  %4471 = vmatprep.mubr.msk.f32.mxu1 %vm5027_vm4, %v5023_v6 }
 0xf7d   :  { %4467 = vmatmul.mubr.msk.f32.vlgmr.msra.gmra.mrb[30].mxu0 %vm465_vm5, %v5613_v39 }
 0xf7e   :  { %4476 = vmatprep.mubr.msk.f32.mxu0 %vm5027_vm4, %v5023_v6 }
 0xfd8   :  { %v2383_v47 = vpop.f32.mrb[20].mxu1 }
 0xfd9   :  { %v2919_v48 = vmul.f32 0.35355338, %v2383_v47  ;;  %v4433_v49 = vpop.f32.mrb[21].mxu1 }
 0xfdb   :  { %v2927_v50 = vadd.f32 %v2919_v48, %v5417_v12 }
 0xfdd   :  { %v2935_v51 = vsel %vm465_vm5, %v2927_v50, -inf }
 0xfde   :  { %2936 = vmax.xlane.f32.xlu0 %v2935_v51 }
 0xfe1   :  { %v2459_v52 = vpop.f32.mrb[24].mxu0 }
 0xfe2   :  { %v2920_v17 = vmul.f32 0.35355338, %v2459_v52  ;;  %v4438_v55 = vpop.f32.mrb[25].mxu0 }
 0xfe4   :  { %v2928_v63 = vadd.f32 %v2920_v17, %v5417_v12 }
 0xfe6   :  { %v2938_v0 = vsel %vm465_vm5, %v2928_v63, -inf }
 0xfe7   :  { %2939 = vmax.xlane.f32.xlu1 %v2938_v0 }
0x1043   :  { %v2611_v56 = vpop.f32.mrb[26].mxu0 }
0x1044   :  { %v2922_v1 = vmul.f32 0.35355338, %v2611_v56  ;;  %v2535_v58 = vpop.f32.mrb[22].mxu1  ;;  %v4448_v57 = vpop.f32.mrb[27].mxu0 }
0x1045   :  { %v2921_v60 = vmul.f32 0.35355338, %v2535_v58  ;;  %v4443_v54 = vpop.f32.mrb[23].mxu1 }
0x1046   :  { %v2930_v59 = vadd.f32 %v2922_v1, %v5417_v12 }
0x1047   :  { %v2929_v61 = vadd.f32 %v2921_v60, %v5417_v12 }
0x1048   :  { %v2687_v62 = vpop.f32.mrb[24].mxu1  ;;  %v2944_v11 = vsel %vm465_vm5, %v2930_v59, -inf }
0x1049   :  { %v2923_v2 = vmul.f32 0.35355338, %v2687_v62  ;;  %v4453_v3 = vpop.f32.mrb[25].mxu1  ;;  %v2941_v4 = vsel %vm465_vm5, %v2929_v61, -inf }
0x104a   :  { %2942 = vmax.xlane.f32.xlu0 %v2941_v4 }
0x104b   :  { %v2931_v5 = vadd.f32 %v2923_v2, %v5417_v12 }
0x104c   :  { %v2763_v9 = vpop.f32.mrb[28].mxu0  ;;  %v2839_v10 = vpop.f32.mrb[26].mxu1 }
0x104d   :  { %v2924_v13 = vmul.f32 0.35355338, %v2763_v9  ;;  %v2925_v14 = vmul.f32 0.35355338, %v2839_v10  ;;  %v4458_v15 = vpop.f32.mrb[29].mxu0  ;;  %v4463_v18 = vpop.f32.mrb[27].mxu1 }
0x104e   :  { %v2947_v19 = vsel %vm465_vm5, %v2931_v5, -inf  ;;  %2945 = vmax.xlane.f32.xlu0 %v2944_v11 }
0x104f   :  { %2948 = vmax.xlane.f32.xlu1 %v2947_v19  ;;  %v2933_v20 = vadd.f32 %v2925_v14, %v5417_v12  ;;  %v2932_v21 = vadd.f32 %v2924_v13, %v5417_v12 }
0x1050   :  { %v2915_v22 = vpop.f32.mrb[30].mxu0 }
0x1051   :  { %v2926_v23 = vmul.f32 0.35355338, %v2915_v22  ;;  %v4468_v7 = vpop.f32.mrb[31].mxu0  ;;  %v2953_v8 = vsel %vm465_vm5, %v2933_v20, -inf  ;;  %v2950_v24 = vsel %vm465_vm5, %v2932_v21, -inf }
0x1052   :  { %2951 = vmax.xlane.f32.xlu0 %v2950_v24 }
0x1053   :  { %2954 = vmax.xlane.f32.xlu1 %v2953_v8  ;;  %v2934_v25 = vadd.f32 %v2926_v23, %v5417_v12 }
0x1055   :  { %v2956_v26 = vsel %vm465_vm5, %v2934_v25, -inf }
0x1056   :  { %2957 = vmax.xlane.f32.xlu0 %v2956_v26 }
0x1064   :  { %3023 = vrot.lane.b32.xlu1 %v5571_v32, %s5030_s11 }
0x1068   :  { %3175 = vrot.lane.b32.xlu1 %v5593_v34, %s5030_s11 }
0x106b   :  { %v2937_v28 = vpop.xlane.xlu0 %2936 }
0x106c   :  { %3251 = vrot.lane.b32.xlu1 %v5589_v33, %s5030_s11  ;;  %3099 = vrot.lane.b32.xlu0 %v5569_v30, %s5030_s11  ;;  %v2959_v31 = vsub.f32 %v2927_v50, %v2937_v28 }
0x106e   :  { %v2967_v32 = vmul.f32 1.442695, %v2959_v31 }
0x1070   :  { %3403 = vrot.lane.b32.xlu1 %v5604_v38, %s5030_s11  ;;  %3327 = vrot.lane.b32.xlu0 %v5599_v36, %s5030_s11 }
0x1074   :  { %v2940_v12 = vpop.xlane.xlu1 %2939 }
0x1075   :  { %v2960_v27 = vsub.f32 %v2928_v63, %v2940_v12 }
0x1077   :  { %v2969_v29 = vmul.f32 1.442695, %v2960_v27 }
0x1079   :  { %4685 = vpow2.f32 %v2969_v29 }
0x107a   :  { %4687 = vpow2.f32 %v2967_v32 }
0x1083   :  { %v5689_v34 = vpop.eup %4685 }
0x1084   :  { %v2986_v33 = vsel %vm465_vm5, %v5689_v34, 0.0  ;;  %v5693_v30 = vpop.eup %4687 }
0x1085   :  { %v2983_v37 = vsel %vm465_vm5, %v5693_v30, 0.0 }
0x108f   :  { %2987 = vadd.xlane.f32.xlu0 %v2986_v33 }
0x1094   :  { %2984 = vadd.xlane.f32.xlu1 %v2983_v37 }
0x10d7   :  { %v2943_v36 = vpop.xlane.xlu0 %2942 }
0x10d8   :  { %v2961_v38 = vsub.f32 %v2929_v61, %v2943_v36 }
0x10da   :  { %v2971_v40 = vmul.f32 1.442695, %v2961_v38 }
0x10db   :  { %v2946_v41 = vpop.xlane.xlu0 %2945 }
0x10dc   :  { %4689 = vpow2.f32 %v2971_v40  ;;  %v2962_v42 = vsub.f32 %v2930_v59, %v2946_v41  ;;  %v2949_v43 = vpop.xlane.xlu1 %2948 }
0x10dd   :  { %v2963_v44 = vsub.f32 %v2931_v5, %v2949_v43  ;;  %v3662_v43 = vld [vmem:[#allocation11 + $0x20] sm:$0xff] }
0x10de   :  { %v2973_v45 = vmul.f32 1.442695, %v2962_v42 }
0x10df   :  { %v2975_v46 = vmul.f32 1.442695, %v2963_v44  ;;  %v2952_v47 = vpop.xlane.xlu0 %2951  ;;  %v3663_v44 = vld [vmem:[#allocation11 + $0x28] sm:$0xff] }
0x10e0   :  { %4691 = vpow2.f32 %v2973_v45  ;;  %v2964_v48 = vsub.f32 %v2932_v21, %v2952_v47  ;;  %v2955_v49 = vpop.xlane.xlu1 %2954  ;;  %v4586_v45 = vpack.c.bf16 %v3663_v44, %v3662_v43  ;;  %v3665_v47 = vld [vmem:[#allocation11 + $0x38] sm:$0xff]  ;;  %v4157_v43 = vld [vmem:[#allocation16 + $0x1] ss:$0 sm:$0xff] }
0x10e1   :  { %4693 = vpow2.f32 %v2975_v46  ;;  %v2965_v50 = vsub.f32 %v2933_v20, %v2955_v49  ;;  %v3664_v46 = vld [vmem:[#allocation11 + $0x30] sm:$0xff] }
0x10e2   :  { %v2977_v51 = vmul.f32 1.442695, %v2964_v48  ;;  %v4590_v48 = vpack.c.bf16 %v3665_v47, %v3664_v46 }
0x10e3   :  { %v2979_v52 = vmul.f32 1.442695, %v2965_v50  ;;  %v2958_v17 = vpop.xlane.xlu0 %2957 }
0x10e4   :  { %4695 = vpow2.f32 %v2977_v51  ;;  %v2966_v55 = vsub.f32 %v2934_v25, %v2958_v17  ;;  %v3024_v63 = vpop.permute.xlu1 %3023 }
0x10e5   :  { %4697 = vpow2.f32 %v2979_v52  ;;  %4470 = vmatpush3.msra.mxu1 %v3024_v63 }
0x10e6   :  { %v4690_v0 = vpop.eup %4689  ;;  %v2981_v56 = vmul.f32 1.442695, %v2966_v55  ;;  %4479 = vmatprep.subr.mxu1 %v5023_v6 }
0x10e7   :  { %v3100_v1 = vpop.permute.xlu0 %3099  ;;  %v2989_v58 = vsel %vm465_vm5, %v4690_v0, 0.0 }
0x10e8   :  { %4699 = vpow2.f32 %v2981_v56  ;;  %2990 = vadd.xlane.f32.xlu1 %v2989_v58  ;;  %4475 = vmatpush3.msra.mxu0 %v3100_v1  ;;  %v3176_v9 = vpop.permute.xlu1 %3175 }
0x10e9   :  { %4484 = vmatprep.subr.mxu0 %v5023_v6 }
0x10ea   :  { %v4692_v57 = vpop.eup %4691 }
0x10eb   :  { %v4694_v60 = vpop.eup %4693  ;;  %v2992_v54 = vsel %vm465_vm5, %v4692_v57, 0.0  ;;  %v3328_v11 = vpop.permute.xlu0 %3327 }
0x10ec   :  { %2993 = vadd.xlane.f32.xlu0 %v2992_v54  ;;  %v2995_v61 = vsel %vm465_vm5, %v4694_v60, 0.0  ;;  %v3252_v10 = vpop.permute.xlu1 %3251 }
0x10ed   :  { %2996 = vadd.xlane.f32.xlu1 %v2995_v61 }
0x10ee   :  { %v4696_v62 = vpop.eup %4695 }
0x10ef   :  { %v4698_v59 = vpop.eup %4697  ;;  %v2998_v2 = vsel %vm465_vm5, %v4696_v62, 0.0 }
0x10f0   :  { %2999 = vadd.xlane.f32.xlu0 %v2998_v2  ;;  %v3001_v3 = vsel %vm465_vm5, %v4698_v59, 0.0  ;;  %v3404_v14 = vpop.permute.xlu1 %3403 }
0x10f1   :  { %3002 = vadd.xlane.f32.xlu1 %v3001_v3 }
0x10f2   :  { %v5704_v4 = vpop.eup %4699 }
0x10f3   :  { %v3004_v5 = vsel %vm465_vm5, %v5704_v4, 0.0 }
0x10f4   :  { %3005 = vadd.xlane.f32.xlu0 %v3004_v5 }
0x1102   :  { %3555 = vrot.lane.b32.xlu1 %v5613_v39, %s5030_s11 }
0x110a   :  { %3479 = vrot.lane.b32.xlu0 %v5597_v35, %s5030_s11 }
0x111c   :  { %v2988_v13 = vpop.xlane.xlu0 %2987 }
0x111d   :  { %4701 = vrcp.f32 %v2988_v13 }
0x1121   :  { %v2985_v15 = vpop.xlane.xlu1 %2984 }
0x1122   :  { %4703 = vrcp.f32 %v2985_v15 }
0x1127   :  { %v4702_v18 = vpop.eup %4701 }
0x1128   :  { %v3016_v19 = vmul.f32 %v4702_v18, %v5689_v34 }
0x112a   :  { %4477 = vmatmul.mubr.msk.f32.vlgmr.msra.gmra.mrb[32].mxu0 %vm465_vm5, %v3016_v19 }
0x112b   :  { %4485 = vmatpush3.msra.mxu0 %v3252_v10  ;;  %4486 = vmatprep.mubr.msk.f32.mxu0 %vm5027_vm4, %v5023_v6 }
0x112c   :  { %v4704_v39 = vpop.eup %4703  ;;  %4494 = vmatprep.subr.mxu0 %v5023_v6 }
0x112d   :  { %v3015_v35 = vmul.f32 %v4704_v39, %v5693_v30 }
0x112f   :  { %4472 = vmatmul.mubr.msk.f32.vlgmr.msra.gmra.mrb[28].mxu1 %vm465_vm5, %v3015_v35 }
0x1130   :  { %4480 = vmatpush3.msra.mxu1 %v3176_v9  ;;  %4481 = vmatprep.mubr.msk.f32.mxu1 %vm5027_vm4, %v5023_v6 }
0x1131   :  { %4489 = vmatprep.subr.mxu1 %v5023_v6 }
0x1175   :  { %v2991_v20 = vpop.xlane.xlu1 %2990 }
0x1176   :  { %4705 = vrcp.f32 %v2991_v20 }
0x1179   :  { %v2994_v21 = vpop.xlane.xlu0 %2993 }
0x117a   :  { %4707 = vrcp.f32 %v2994_v21  ;;  %v2997_v22 = vpop.xlane.xlu1 %2996 }
0x117b   :  { %4709 = vrcp.f32 %v2997_v22 }
0x117d   :  { %v3000_v23 = vpop.xlane.xlu0 %2999 }
0x117e   :  { %4711 = vrcp.f32 %v3000_v23  ;;  %v3003_v7 = vpop.xlane.xlu1 %3002 }
0x117f   :  { %4713 = vrcp.f32 %v3003_v7 }
0x1180   :  { %v4706_v8 = vpop.eup %4705 }
0x1181   :  { %v3017_v24 = vmul.f32 %v4706_v8, %v4690_v0  ;;  %v3006_v25 = vpop.xlane.xlu0 %3005 }
0x1182   :  { %4715 = vrcp.f32 %v3006_v25  ;;  %v3556_v30 = vpop.permute.xlu1 %3555 }
0x1183   :  { %4482 = vmatmul.mubr.msk.f32.vlgmr.msra.gmra.mrb[30].mxu1 %vm465_vm5, %v3017_v24 }
0x1184   :  { %v4708_v26 = vpop.eup %4707  ;;  %4490 = vmatpush3.msra.mxu1 %v3328_v11  ;;  %4491 = vmatprep.mubr.msk.f32.mxu1 %vm5027_vm4, %v5023_v6  ;;  %v4153_v11 = vld [vmem:[#allocation13 + $0x1] ss:$0 sm:$0xff] }
0x1185   :  { %v4710_v12 = vpop.eup %4709  ;;  %v3018_v27 = vmul.f32 %v4708_v26, %v4692_v57  ;;  %4499 = vmatprep.subr.mxu1 %v5023_v6  ;;  %v3480_v29 = vpop.permute.xlu0 %3479 }
0x1186   :  { %v3019_v28 = vmul.f32 %v4710_v12, %v4694_v60  ;;  %v3804_v12 = vld [vmem:[#allocation17 + $0x20] sm:$0xff] }
0x1187   :  { %4487 = vmatmul.mubr.msk.f32.vlgmr.msra.gmra.mrb[34].mxu0 %vm465_vm5, %v3018_v27  ;;  %v3805_v27 = vld [vmem:[#allocation17 + $0x28] sm:$0xff] }
0x1188   :  { %v4712_v31 = vpop.eup %4711  ;;  %4492 = vmatmul.mubr.msk.f32.vlgmr.msra.gmra.mrb[32].mxu1 %vm465_vm5, %v3019_v28  ;;  %4495 = vmatpush3.msra.mxu0 %v3404_v14  ;;  %v4594_v28 = vpack.c.bf16 %v3805_v27, %v3804_v12 }
0x1189   :  { %v4714_v32 = vpop.eup %4713  ;;  %v3020_v34 = vmul.f32 %v4712_v31, %v4696_v62  ;;  %4500 = vmatpush3.msra.mxu1 %v3480_v29  ;;  %4496 = vmatprep.mubr.msk.f32.mxu0 %vm5027_vm4, %v5023_v6  ;;  %v3806_v29 = vld [vmem:[#allocation17 + $0x30] sm:$0xff]  ;;  %v3807_v31 = vld [vmem:[#allocation17 + $0x38] sm:$0xff] }
0x118a   :  { %v3021_v33 = vmul.f32 %v4714_v32, %v4698_v59  ;;  %4501 = vmatprep.mubr.msk.f32.mxu1 %vm5027_vm4, %v5023_v6  ;;  %4504 = vmatprep.subr.mxu0 %v5023_v6  ;;  %v4598_v32 = vpack.c.bf16 %v3807_v31, %v3806_v29 }
0x118b   :  { %4497 = vmatmul.mubr.msk.f32.vlgmr.msra.gmra.mrb[36].mxu0 %vm465_vm5, %v3020_v34  ;;  %4587 = vmatprep.subr.bf16.mxu1 %v4586_v45 }
0x118c   :  { %v4716_v37 = vpop.eup %4715  ;;  %4502 = vmatmul.mubr.msk.f32.vlgmr.msra.gmra.mrb[34].mxu1 %vm465_vm5, %v3021_v33  ;;  %4505 = vmatpush3.msra.mxu0 %v3556_v30 }
0x118d   :  { %v3022_v36 = vmul.f32 %v4716_v37, %v5704_v4  ;;  %4506 = vmatprep.mubr.msk.f32.mxu0 %vm5027_vm4, %v5023_v6  ;;  %4589 = vmatpush3.bf16.msra.mxu1 %v4586_v45 }
0x118e   :  { %4591 = vmatprep.subr.bf16.mxu1 %v4590_v48  ;;  %4595 = vmatprep.subr.bf16.mxu0 %v4594_v28 }
0x118f   :  { %4507 = vmatmul.mubr.msk.f32.vlgmr.msra.gmra.mrb[38].mxu0 %vm465_vm5, %v3022_v36 }
0x1190   :  { %4597 = vmatpush3.bf16.msra.mxu0 %v4594_v28 }
0x1191   :  { %4593 = vmatpush3.bf16.msra.mxu1 %v4590_v48  ;;  %4599 = vmatprep.subr.bf16.mxu0 %v4598_v32 }
0x1194   :  { %4601 = vmatpush3.bf16.msra.mxu0 %v4598_v32 }
0x11fd   :  { %v3171_v38 = vpop.f32.mrb[32].mxu0 }
0x11fe   :  { %v4478_v40 = vpop.f32.mrb[33].mxu0 }
0x1202   :  { %v3095_v41 = vpop.f32.mrb[28].mxu1 }
0x1203   :  { %v4473_v42 = vpop.f32.mrb[29].mxu1 }
0x1256   :  { %v3247_v49 = vpop.f32.mrb[30].mxu1 }
0x1257   :  { %3633 = vrot.lane.b32.xlu0 %v3247_v49, %s5011_s19  ;;  %v4483_v6 = vpop.f32.mrb[31].mxu1 }
0x1258   :  { %v4161_v6 = vld [vmem:[%s5828_s13 + $0x20] sm:$0xff] }
0x125a   :  { %v3323_v50 = vpop.f32.mrb[34].mxu0 }
0x125b   :  { %v3399_v51 = vpop.f32.mrb[32].mxu1  ;;  %3635 = vrot.lane.b32.xlu1 %v3323_v50, %s5011_s19  ;;  %v4488_v52 = vpop.f32.mrb[35].mxu0  ;;  %v4162_v50 = vld [vmem:[%s5828_s13 + $0x28] sm:$0xff] }
0x125c   :  { %3641 = vrot.lane.b32.xlu0 %v3399_v51, %s5014_s24  ;;  %v4493_v17 = vpop.f32.mrb[33].mxu1  ;;  %v4163_v51 = vld [vmem:[%s5828_s13 + $0x30] sm:$0xff]  ;;  %v4602_v52 = vpack.c.bf16 %v4162_v50, %v4161_v6 }
0x125d   :  { %v4164_v17 = vld [vmem:[%s5828_s13 + $0x38] sm:$0xff] }
0x125e   :  { %v3475_v55 = vpop.f32.mrb[36].mxu0  ;;  %4603 = vmatprep.subr.bf16.mxu1 %v4602_v52 }
0x125f   :  { %v3551_v63 = vpop.f32.mrb[34].mxu1  ;;  %3643 = vrot.lane.b32.xlu1 %v3475_v55, %s5014_s24  ;;  %v4498_v0 = vpop.f32.mrb[37].mxu0  ;;  %v4606_v55 = vpack.c.bf16 %v4164_v17, %v4163_v51 }
0x1260   :  { %3649 = vrot.lane.b32.xlu0 %v3551_v63, %s5031_s9  ;;  %v4503_v56 = vpop.f32.mrb[35].mxu1  ;;  %v4158_v63 = vld [vmem:[#allocation19 + $0x1] ss:$0 sm:$0xff] }
0x1262   :  { %v3627_v1 = vpop.f32.mrb[38].mxu0 }
0x1263   :  { %3651 = vrot.lane.b32.xlu1 %v3627_v1, %s5031_s9  ;;  %v4508_v58 = vpop.f32.mrb[39].mxu0 }
0x12c9   :  { %v3634_v57 = vpop.permute.xlu0 %3633 }
0x12ca   :  { %v3655_v61 = vsel %vm465_vm5, %v3095_v41, %v3634_v57  ;;  %v4156_v41 = vld [vmem:[#allocation14 + $0x1] ss:$0 sm:$0xff] }
0x12cd   :  { %v3636_v60 = vpop.permute.xlu1 %3635 }
0x12ce   :  { %v3642_v54 = vpop.permute.xlu0 %3641  ;;  %v3656_v4 = vsel %vm465_vm5, %v3171_v38, %v3636_v60 }
0x12cf   :  { %v3657_v59 = vsel %vm222_vm0, %v3655_v61, %v3642_v54 }
0x12d1   :  { %v3644_v62 = vpop.permute.xlu1 %3643 }
0x12d2   :  { %v3650_v2 = vpop.permute.xlu0 %3649  ;;  %v3658_v5 = vsel %vm222_vm0, %v3656_v4, %v3644_v62 }
0x12d3   :  { %v3659_v3 = vsel %vm1812_vm7, %v3657_v59, %v3650_v2 }
0x12d4   :  { %4517 = vmatprep.mubr.msk.f32.mxu1 %vm313_vm3, %v3659_v3 }
0x12d5   :  { %v3652_v9 = vpop.permute.xlu1 %3651 }
0x12d6   :  { %v3660_v10 = vsel %vm1812_vm7, %v3658_v5, %v3652_v9 }
0x12d7   :  { %4518 = vmatmul.mubr.msk.f32.vlgmr.msra.gmra.mrb[36].mxu1 %vm313_vm3, %v3660_v10 }
0x12d8   :  { %4605 = vmatpush3.bf16.msra.mxu1 %v4602_v52 }
0x12d9   :  { %4607 = vmatprep.subr.bf16.mxu1 %v4606_v55 }
0x12dc   :  { %4609 = vmatpush3.bf16.msra.mxu1 %v4606_v55 }
0x13aa   :  { %v4519_v13 = vpop.f32.mrb[36].mxu1 }
0x13ab   :  { %v3752_v14 = vadd.f32 %v4519_v13, %v4153_v11  ;;  %v3746_v15 = vpop.f32.mrb[37].mxu1 }
0x13ac   :  { %v3747_v18 = vadd.f32 %v4153_v11, %v3746_v15 }
0x13ad   :  { %v5754_v19 = vadd.f32 %v3752_v14, %v5548_v53 }
0x13ae   :  { %v5757_v39 = vadd.f32 %v3747_v18, %v5551_v16 }
0x13af   :  { %v3764_v35 = vsel %vm313_vm3, %v5754_v19, 0.0 }
0x13b0   :  { %3765 = vadd.xlane.f32.xlu1 %v3764_v35  ;;  %v3761_v20 = vsel %vm313_vm3, %v5757_v39, 0.0 }
0x13b1   :  { %3762 = vadd.xlane.f32.xlu0 %v3761_v20  ;;  %v4166_v20 = vld [vmem:[%s5829_s14 + $0x1] ss:$0 sm:$0xff] }
0x143d   :  { %v3766_v21 = vpop.xlane.xlu1 %3765 }
0x143e   :  { %v3768_v22 = vmul.f32 0.03125, %v3766_v21  ;;  %v3763_v23 = vpop.xlane.xlu0 %3762 }
0x143f   :  { %v3767_v7 = vmul.f32 0.03125, %v3763_v23 }
0x1440   :  { %v3770_v8 = vsub.f32 %v5754_v19, %v3768_v22 }
0x1441   :  { %v3769_v53 = vsub.f32 %v5757_v39, %v3767_v7 }
0x1442   :  { %v3772_v25 = vmul.f32 %v3770_v8, %v3770_v8 }
0x1443   :  { %v3771_v24 = vmul.f32 %v3769_v53, %v3769_v53 }
0x1444   :  { %v3776_v26 = vsel %vm313_vm3, %v3772_v25, 0.0 }
0x1445   :  { %v3773_v16 = vsel %vm313_vm3, %v3771_v24, 0.0 }
0x1446   :  { %3774 = vadd.xlane.f32.xlu0 %v3773_v16 }
0x144a   :  { %3777 = vadd.xlane.f32.xlu0 %v3776_v26 }
0x14d3   :  { %v3775_v34 = vpop.xlane.xlu0 %3774 }
0x14d4   :  { %v3779_v33 = vmul.f32 0.03125, %v3775_v34 }
0x14d6   :  { %v3781_v30 = vadd.f32 1e-05, %v3779_v33 }
0x14d7   :  { %v3778_v37 = vpop.xlane.xlu0 %3777 }
0x14d8   :  { %4717 = vrsqrt.f32 %v3781_v30  ;;  %v3780_v36 = vmul.f32 0.03125, %v3778_v37 }
0x14da   :  { %v3782_v38 = vadd.f32 1e-05, %v3780_v36 }
0x14dc   :  { %4719 = vrsqrt.f32 %v3782_v38 }
0x14e2   :  { %v4718_v40 = vpop.eup %4717 }
0x14e3   :  { %v3785_v42 = vmul.f32 %v4718_v40, %v3769_v53 }
0x14e5   :  { %v3793_v44 = vmul.f32 %v4156_v41, %v3785_v42 }
0x14e6   :  { %v4720_v45 = vpop.eup %4719 }
0x14e7   :  { %v3786_v46 = vmul.f32 %v4720_v45, %v3770_v8  ;;  %v3801_v47 = vadd.f32 %v4157_v43, %v3793_v44  ;;  %v4170_v45 = vld [vmem:[%s5831_s16] ss:$0 sm:$0xff] }
0x14e9   :  { %v3794_v48 = vmul.f32 %v4156_v41, %v3786_v46  ;;  %4528 = vmatprep.mubr.msk.f32.mxu0 %vm313_vm3, %v3801_v47  ;;  %v4169_v41 = vld [vmem:[%s5830_s15] ss:$0 sm:$0xff] }
0x14eb   :  { %v3802_v49 = vadd.f32 %v4157_v43, %v3794_v48 }
0x14ed   :  { %4529 = vmatmul.mubr.msk.f32.vlgmr.msra.gmra.mrb[40].mxu0 %vm313_vm3, %v3802_v49 }
0x15c0   :  { %v4530_v0 = vpop.f32.mrb[40].mxu0 }
0x15c1   :  { %v3894_v56 = vadd.f32 %v4530_v0, %v4158_v63  ;;  %v3888_v1 = vpop.f32.mrb[41].mxu0 }
0x15c2   :  { %v3889_v58 = vadd.f32 %v4158_v63, %v3888_v1 }
0x15c3   :  { %v3900_v57 = vmul.f32 0.044715, %v3894_v56  ;;  %v3898_v15 = vmul.f32 0.5, %v3894_v56 }
0x15c4   :  { %v3899_v60 = vmul.f32 0.044715, %v3889_v58  ;;  %v3897_v13 = vmul.f32 0.5, %v3889_v58 }
0x15c5   :  { %v3902_v54 = vmul.f32 %v3900_v57, %v3894_v56 }
0x15c6   :  { %v3901_v61 = vmul.f32 %v3899_v60, %v3889_v58 }
0x15c7   :  { %v3904_v62 = vmul.f32 %v3902_v54, %v3894_v56 }
0x15c8   :  { %v3903_v59 = vmul.f32 %v3901_v61, %v3889_v58 }
0x15c9   :  { %v3906_v2 = vadd.f32 %v3904_v62, %v3894_v56 }
0x15ca   :  { %v3905_v3 = vadd.f32 %v3903_v59, %v3889_v58 }
0x15cb   :  { %v3908_v4 = vmul.f32 0.7978845, %v3906_v2 }
0x15cc   :  { %v3907_v5 = vmul.f32 0.7978845, %v3905_v3 }
0x15cd   :  { %4721 = vtanh.f32 %v3908_v4 }
0x15ce   :  { %4723 = vtanh.f32 %v3907_v5 }
0x15d7   :  { %v4722_v9 = vpop.eup %4721 }
0x15d8   :  { %v4724_v10 = vpop.eup %4723  ;;  %v3912_v11 = vadd.f32 1.0, %v4722_v9 }
0x15d9   :  { %v3911_v14 = vadd.f32 1.0, %v4724_v10 }
0x15da   :  { %v3914_v35 = vmul.f32 %v3912_v11, %v3898_v15 }
0x15db   :  { %v3913_v18 = vmul.f32 %v3911_v14, %v3897_v13 }
0x15dd   :  { %4539 = vmatprep.mubr.msk.f32.mxu1 %vm313_vm3, %v3913_v18 }
0x15de   :  { %4540 = vmatmul.mubr.msk.f32.vlgmr.msra.gmra.mrb[38].mxu1 %vm313_vm3, %v3914_v35 }
0x16b1   :  { %v4541_v21 = vpop.f32.mrb[38].mxu1 }
0x16b2   :  { %v4006_v22 = vadd.f32 %v4541_v21, %v4166_v20  ;;  %v4000_v23 = vpop.f32.mrb[39].mxu1 }
0x16b3   :  { %v4001_v7 = vadd.f32 %v4166_v20, %v4000_v23 }
0x16b4   :  { %v4010_v8 = vadd.f32 %v4006_v22, %v5754_v19 }
0x16b5   :  { %v4009_v53 = vadd.f32 %v4001_v7, %v5757_v39 }
0x16b6   :  { %v4016_v24 = vsel %vm313_vm3, %v4010_v8, 0.0 }
0x16b7   :  { %4017 = vadd.xlane.f32.xlu0 %v4016_v24  ;;  %v4013_v16 = vsel %vm313_vm3, %v4009_v53, 0.0 }
0x16b8   :  { %4014 = vadd.xlane.f32.xlu1 %v4013_v16 }
0x1744   :  { %v4018_v25 = vpop.xlane.xlu0 %4017 }
0x1745   :  { %v4020_v26 = vmul.f32 0.03125, %v4018_v25  ;;  %v4015_v12 = vpop.xlane.xlu1 %4014 }
0x1746   :  { %v4019_v27 = vmul.f32 0.03125, %v4015_v12 }
0x1747   :  { %v4022_v28 = vsub.f32 %v4010_v8, %v4020_v26 }
0x1748   :  { %v4021_v29 = vsub.f32 %v4009_v53, %v4019_v27 }
0x1749   :  { %v4024_v31 = vmul.f32 %v4022_v28, %v4022_v28 }
0x174a   :  { %v4023_v32 = vmul.f32 %v4021_v29, %v4021_v29 }
0x174b   :  { %v4028_v34 = vsel %vm313_vm3, %v4024_v31, 0.0 }
0x174c   :  { %4029 = vadd.xlane.f32.xlu0 %v4028_v34  ;;  %v4025_v19 = vsel %vm313_vm3, %v4023_v32, 0.0 }
0x174d   :  { %4026 = vadd.xlane.f32.xlu1 %v4025_v19 }
0x17d9   :  { %v4030_v39 = vpop.xlane.xlu0 %4029 }
0x17da   :  { %v4032_v33 = vmul.f32 0.03125, %v4030_v39  ;;  %v4027_v30 = vpop.xlane.xlu1 %4026 }
0x17db   :  { %v4031_v37 = vmul.f32 0.03125, %v4027_v30 }
0x17dc   :  { %v4034_v36 = vadd.f32 1e-05, %v4032_v33 }
0x17dd   :  { %v4033_v38 = vadd.f32 1e-05, %v4031_v37 }
0x17de   :  { %4725 = vrsqrt.f32 %v4034_v36 }
0x17df   :  { %4727 = vrsqrt.f32 %v4033_v38 }
0x17e8   :  { %v4726_v40 = vpop.eup %4725 }
0x17e9   :  { %v4728_v42 = vpop.eup %4727  ;;  %v4038_v43 = vmul.f32 %v4726_v40, %v4022_v28 }
0x17ea   :  { %v4037_v44 = vmul.f32 %v4728_v42, %v4021_v29 }
0x17eb   :  { %v4046_v46 = vmul.f32 %v4169_v41, %v4038_v43 }
0x17ec   :  { %v4045_v47 = vmul.f32 %v4169_v41, %v4037_v44 }
0x17ed   :  { %v4054_v48 = vadd.f32 %v4170_v45, %v4046_v46 }
0x17ee   :  { %v4053_v49 = vadd.f32 %v4170_v45, %v4045_v47 }
0x17ef   :  { %4056 = vst.msk [vmem:[#allocation20 + $0x8] sm:$0xff] %vm313_vm3, %v4054_v48 }
0x17f0   :  { %4055 = vst.msk [vmem:[#allocation20] sm:$0xff] %vm313_vm3, %v4053_v49 }
0x17f1   :  { %4982 = shalt.err (!%p4979_p8)
}
0x17f2   :  { %s4983_s29 = scalar_lea.hbm %s5832_s17, 256 }
0x17f3   :  { %p4984_p9 = scmp.ne.s32.totalorder %s5832_s17, %s4983_s29  ;;  %p4987_p10 = scmp.lt.u32.totalorder %s4983_s29, %s5832_s17 }
0x17f5   :  { %p4989_p11 = pnand %p4987_p10, %p4984_p9 }
0x17f7   :  { %4992 = shalt.err (!%p4989_p11)
}
0x17f8   :  { %4068 = dma.vmem_to_hbm [thread:$0]  %s4063_s0, 256, %s5832_s17, [#allocation4], %s5010_s25, %s5010_s25, %s5011_s19  }
0x17f9   :  { %5005 = dma.done.wait [#allocation4], 256  }
0x17fa   :  { %5006 = vsyncadd [#allocation4], 4294967040 }
0x17fb   :  { %4072 = vsyncpa [#allocation3], 1 }
0x17fc   :  { %4073 = vsyncpa [#allocation6], 1 }
0x17fd   :  { %4074 = vsyncpa [#allocation9], 1 }
0x17fe   :  { %4075 = vsyncpa [#allocation12], 1 }
0x17ff   :  { %4076 = vsyncpa [#allocation15], 1 }
0x1800   :  { %4077 = vsyncpa [#allocation18], 1 }
0x1801   :  { %4078 = vsyncpa [#allocation4], 1 }

</bundles_post_ra>
